<compile_context>
chip_gen: v6e
topology: v6e:2x2x1
jax: 0.10.0
libtpu: 0.0.40
codegen_flags: <defaults>
</compile_context>

<pallas_src>
import jax
import jax.numpy as jnp
from jax.experimental import pallas as pl
from jax.experimental.pallas import tpu as pltpu


def _maxpool3x3_s1_kernel(x_ref, o_ref, wpad_ref, hpad_ref):
    """3x3 / stride-1 / pad-1 max pool on one NHWC batch block.

    x_ref, o_ref : (1, H, W, C)            VMEM
    wpad_ref     : (1, H, 8 + W + 1, C)    VMEM scratch, -inf halo along W
    hpad_ref     : (1, H + 2, W, C)        VMEM scratch, -inf halo along H
    """
    H = x_ref.shape[1]
    W = x_ref.shape[2]
    OFF = 8  # sublane-tile-aligned offset for the W staging store

    # ---- Pass 1: 3-tap max along W (W = sublane axis, C = lane axis) -------
    # Fill the scratch with -inf, then drop the unpadded rows at sublane
    # offset 8 (tile-aligned).  Columns OFF-1 and OFF+W stay -inf and act as
    # the left/right halo, so the three shifted reads below implement the
    # PyTorch -inf padding semantics with plain static-offset loads.
    wpad_ref[...] = jnp.full(wpad_ref.shape, -jnp.inf, dtype=wpad_ref.dtype)
    wpad_ref[:, :, OFF:OFF + W, :] = x_ref[...]
    rowmax = jnp.maximum(
        jnp.maximum(wpad_ref[:, :, OFF - 1:OFF - 1 + W, :],   # left neighbor
                    wpad_ref[:, :, OFF:OFF + W, :]),          # center
        wpad_ref[:, :, OFF + 1:OFF + 1 + W, :])               # right neighbor

    # ---- Pass 2: 3-tap max along H (H = outer dim -> shifts are addressing) -
    hpad_ref[...] = jnp.full(hpad_ref.shape, -jnp.inf, dtype=hpad_ref.dtype)
    hpad_ref[:, 1:H + 1, :, :] = rowmax
    o_ref[...] = jnp.maximum(
        jnp.maximum(hpad_ref[:, 0:H, :, :], hpad_ref[:, 1:H + 1, :, :]),
        hpad_ref[:, 2:H + 2, :, :])


def maxpool2d_3x3_s1_p1_nhwc(x_nhwc):
    """MaxPool2d(3, stride=1, padding=1) on an NHWC tensor (no layout glue)."""
    N, H, W, C = x_nhwc.shape
    dtype = x_nhwc.dtype
    itemsize = jnp.dtype(dtype).itemsize

    cost = pl.CostEstimate(
        flops=9 * N * H * W * C,                 # compares per output window
        transcendentals=0,
        bytes_accessed=2 * N * H * W * C * itemsize,
    )

    return pl.pallas_call(
        _maxpool3x3_s1_kernel,
        out_shape=jax.ShapeDtypeStruct((N, H, W, C), dtype),
        grid=(N,),
        in_specs=[pl.BlockSpec((1, H, W, C), lambda n: (n, 0, 0, 0))],
        out_specs=pl.BlockSpec((1, H, W, C), lambda n: (n, 0, 0, 0)),
        scratch_shapes=[
            pltpu.VMEM((1, H, 8 + W + 1, C), dtype),   # W-halo staging buffer
            pltpu.VMEM((1, H + 2, W, C), dtype),       # H-halo staging buffer
        ],
        compiler_params=pltpu.CompilerParams(
            dimension_semantics=("parallel",)),
        cost_estimate=cost,
    )(x_nhwc)


def maxpool2d_3x3_s1_p1(x_nchw):
    """Drop-in equivalent of nn.MaxPool2d(3, stride=1, padding=1, ceil_mode=True).

    With kernel=3 / stride=1 / padding=1, ceil_mode gives the same output size
    as floor mode, so the output spatial dims equal the input spatial dims.
    NCHW -> NHWC puts the 832 channels on the 128-lane axis (~49 live vregs)
    instead of 832 nearly-empty (7,7) vregs; the two transposes exist only for
    NCHW boundary parity (see TODO at top).
    """
    x_nhwc = jnp.transpose(x_nchw, (0, 2, 3, 1))
    y_nhwc = maxpool2d_3x3_s1_p1_nhwc(x_nhwc)
    return jnp.transpose(y_nhwc, (0, 3, 1, 2))


if __name__ == "__main__":
    key = jax.random.PRNGKey(0)
    # Shape from the module: torch.randn([1, 832, 7, 7])
    x = jax.random.normal(key, (1, 832, 7, 7), dtype=jnp.float32)

    fn = jax.jit(maxpool2d_3x3_s1_p1)
    y = jax.block_until_ready(fn(x))

    # Reference: pure-JAX reduce_window max pool with -inf padding.
    ref = jax.lax.reduce_window(
        x, -jnp.inf, jax.lax.max,
        window_dimensions=(1, 1, 3, 3),
        window_strides=(1, 1, 1, 1),
        padding=((0, 0), (0, 0), (1, 1), (1, 1)),
    )
    assert y.shape == (1, 832, 7, 7)
    assert jnp.allclose(y, ref), "Pallas maxpool mismatch vs reference"

    print("KERNEL_OK")
</pallas_src>

<mosaic_0001>
module attributes {stable_mosaic.version = 11 : i64} {
  func.func @_maxpool3x3_s1_kernel(%arg0: i32, %arg1: memref<1x7x7x832xf32, #tpu.memory_space<vmem>>, %arg2: memref<1x7x7x832xf32, #tpu.memory_space<vmem>>, %arg3: memref<1x7x16x832xf32, #tpu.memory_space<vmem>>, %arg4: memref<1x9x7x832xf32, #tpu.memory_space<vmem>>) attributes {dimension_semantics = [#tpu.dimension_semantics<parallel>], iteration_bounds = array<i64: 1>, scalar_prefetch = 0 : i64, scratch_operands = 2 : i64, tpu.core_type = #tpu.core_type<tc>, window_params = [{transform_indices = @transform_0, window_bounds = array<i64: 1, 7, 7, 832>}, {transform_indices = @transform_1, window_bounds = array<i64: 1, 7, 7, 832>}]} {
    %cst = arith.constant 0xFF800000 : f32
    %0 = vector.broadcast %cst : f32 to vector<1x7x16x832xf32>
    %c0 = arith.constant 0 : index
    %c0_0 = arith.constant 0 : index
    %c0_1 = arith.constant 0 : index
    %c0_2 = arith.constant 0 : index
    %1 = vector.load %arg3[%c0, %c0_0, %c0_1, %c0_2] : memref<1x7x16x832xf32, #tpu.memory_space<vmem>>, vector<1x7x16x832xf32>
    tpu.vector_store %arg3[%c0, %c0_0, %c0_1, %c0_2], %0 {strides = array<i32>} : memref<1x7x16x832xf32, #tpu.memory_space<vmem>>, vector<1x7x16x832xf32>,
    %c0_3 = arith.constant 0 : index
    %c0_4 = arith.constant 0 : index
    %c0_5 = arith.constant 0 : index
    %c0_6 = arith.constant 0 : index
    %2 = vector.load %arg1[%c0_3, %c0_4, %c0_5, %c0_6] : memref<1x7x7x832xf32, #tpu.memory_space<vmem>>, vector<1x7x7x832xf32>
    %c0_7 = arith.constant 0 : index
    %c0_8 = arith.constant 0 : index
    %c8 = arith.constant 8 : index
    %c0_9 = arith.constant 0 : index
    %3 = vector.load %arg3[%c0_7, %c0_8, %c8, %c0_9] : memref<1x7x16x832xf32, #tpu.memory_space<vmem>>, vector<1x7x7x832xf32>
    tpu.vector_store %arg3[%c0_7, %c0_8, %c8, %c0_9], %2 {strides = array<i32>} : memref<1x7x16x832xf32, #tpu.memory_space<vmem>>, vector<1x7x7x832xf32>,
    %c0_10 = arith.constant 0 : index
    %c0_11 = arith.constant 0 : index
    %c7 = arith.constant 7 : index
    %c0_12 = arith.constant 0 : index
    %4 = vector.load %arg3[%c0_10, %c0_11, %c7, %c0_12] : memref<1x7x16x832xf32, #tpu.memory_space<vmem>>, vector<1x7x7x832xf32>
    %c0_13 = arith.constant 0 : index
    %c0_14 = arith.constant 0 : index
    %c8_15 = arith.constant 8 : index
    %c0_16 = arith.constant 0 : index
    %5 = vector.load %arg3[%c0_13, %c0_14, %c8_15, %c0_16] : memref<1x7x16x832xf32, #tpu.memory_space<vmem>>, vector<1x7x7x832xf32>
    %6 = arith.maximumf %4, %5 : vector<1x7x7x832xf32>
    %c0_17 = arith.constant 0 : index
    %c0_18 = arith.constant 0 : index
    %c9 = arith.constant 9 : index
    %c0_19 = arith.constant 0 : index
    %7 = vector.load %arg3[%c0_17, %c0_18, %c9, %c0_19] : memref<1x7x16x832xf32, #tpu.memory_space<vmem>>, vector<1x7x7x832xf32>
    %8 = arith.maximumf %6, %7 : vector<1x7x7x832xf32>
    %cst_20 = arith.constant 0xFF800000 : f32
    %9 = vector.broadcast %cst_20 : f32 to vector<1x9x7x832xf32>
    %c0_21 = arith.constant 0 : index
    %c0_22 = arith.constant 0 : index
    %c0_23 = arith.constant 0 : index
    %c0_24 = arith.constant 0 : index
    %10 = vector.load %arg4[%c0_21, %c0_22, %c0_23, %c0_24] : memref<1x9x7x832xf32, #tpu.memory_space<vmem>>, vector<1x9x7x832xf32>
    tpu.vector_store %arg4[%c0_21, %c0_22, %c0_23, %c0_24], %9 {strides = array<i32>} : memref<1x9x7x832xf32, #tpu.memory_space<vmem>>, vector<1x9x7x832xf32>,
    %c0_25 = arith.constant 0 : index
    %c1 = arith.constant 1 : index
    %c0_26 = arith.constant 0 : index
    %c0_27 = arith.constant 0 : index
    %11 = vector.load %arg4[%c0_25, %c1, %c0_26, %c0_27] : memref<1x9x7x832xf32, #tpu.memory_space<vmem>>, vector<1x7x7x832xf32>
    tpu.vector_store %arg4[%c0_25, %c1, %c0_26, %c0_27], %8 {strides = array<i32>} : memref<1x9x7x832xf32, #tpu.memory_space<vmem>>, vector<1x7x7x832xf32>,
    %c0_28 = arith.constant 0 : index
    %c0_29 = arith.constant 0 : index
    %c0_30 = arith.constant 0 : index
    %c0_31 = arith.constant 0 : index
    %12 = vector.load %arg4[%c0_28, %c0_29, %c0_30, %c0_31] : memref<1x9x7x832xf32, #tpu.memory_space<vmem>>, vector<1x7x7x832xf32>
    %c0_32 = arith.constant 0 : index
    %c1_33 = arith.constant 1 : index
    %c0_34 = arith.constant 0 : index
    %c0_35 = arith.constant 0 : index
    %13 = vector.load %arg4[%c0_32, %c1_33, %c0_34, %c0_35] : memref<1x9x7x832xf32, #tpu.memory_space<vmem>>, vector<1x7x7x832xf32>
    %14 = arith.maximumf %12, %13 : vector<1x7x7x832xf32>
    %c0_36 = arith.constant 0 : index
    %c2 = arith.constant 2 : index
    %c0_37 = arith.constant 0 : index
    %c0_38 = arith.constant 0 : index
    %15 = vector.load %arg4[%c0_36, %c2, %c0_37, %c0_38] : memref<1x9x7x832xf32, #tpu.memory_space<vmem>>, vector<1x7x7x832xf32>
    %16 = arith.maximumf %14, %15 : vector<1x7x7x832xf32>
    %c0_39 = arith.constant 0 : index
    %c0_40 = arith.constant 0 : index
    %c0_41 = arith.constant 0 : index
    %c0_42 = arith.constant 0 : index
    %17 = vector.load %arg2[%c0_39, %c0_40, %c0_41, %c0_42] : memref<1x7x7x832xf32, #tpu.memory_space<vmem>>, vector<1x7x7x832xf32>
    tpu.vector_store %arg2[%c0_39, %c0_40, %c0_41, %c0_42], %16 {strides = array<i32>} : memref<1x7x7x832xf32, #tpu.memory_space<vmem>>, vector<1x7x7x832xf32>,
    return
  }
  func.func @transform_0(%arg0: i32) -> (i32, i32, i32, i32) {
    %c0_i32 = arith.constant 0 : i32
    %c0_i32_0 = arith.constant 0 : i32
    %c0_i32_1 = arith.constant 0 : i32
    %c0_i32_2 = arith.constant 0 : i32
    return %arg0, %c0_i32, %c0_i32_0, %c0_i32_1 : i32, i32, i32, i32
  }
  func.func @transform_1(%arg0: i32) -> (i32, i32, i32, i32) {
    %c0_i32 = arith.constant 0 : i32
    %c0_i32_0 = arith.constant 0 : i32
    %c0_i32_1 = arith.constant 0 : i32
    %c0_i32_2 = arith.constant 0 : i32
    return %arg0, %c0_i32, %c0_i32_0, %c0_i32_1 : i32, i32, i32, i32
  }
}

</mosaic_0001>

<bundles_post_ra>
// kernel: maxpool2d_3x3_s1_p1.1
= control target key start
LH: loop header
LB: loop body
LE: loop exit
PB: predicated region body
PF: predicated region fallthrough
CT: control target
= control target key end

     0   :  { %vm14_vm0 = vcmask 523264   ;;  %vm162_vm1 = vcmask 522240   ;;  %v1600_v0 = vmov -inf   ;;  %vm1053_vm2 = vcmask 1040384   ;;  %s2159_s0 = inlined_call_operand.vmem [shape: f32[1,7,7,832], index: 0, kind: input, shape index: {}]   ;;  %s2160_s1 = inlined_call_operand.vmem [shape: f32[1,7,7,832], index: 1, kind: output, shape index: {}]  }
   0x1   :  { %16 = vst [vmem:[#allocation2 + $0x38] sm:$0xff] %v1600_v0  ;;  %8 = vst [vmem:[#allocation2] sm:$0xff] %v1600_v0  ;;  %v107_v1 = vld [vmem:[%s2159_s0] sm:$0x7f]  ;;  %v108_v2 = vld [vmem:[%s2159_s0 + $0x8] sm:$0x7f] }
   0x2   :  { %9 = vst [vmem:[#allocation2 + $0x8] sm:$0xff] %v1600_v0  ;;  %10 = vst [vmem:[#allocation2 + $0x10] sm:$0xff] %v1600_v0  ;;  %v109_v3 = vld [vmem:[%s2159_s0 + $0x10] sm:$0x7f]  ;;  %v110_v4 = vld [vmem:[%s2159_s0 + $0x18] sm:$0x7f] }
   0x3   :  { %11 = vst [vmem:[#allocation2 + $0x18] sm:$0xff] %v1600_v0  ;;  %12 = vst [vmem:[#allocation2 + $0x20] sm:$0xff] %v1600_v0  ;;  %v111_v5 = vld [vmem:[%s2159_s0 + $0x20] sm:$0x7f]  ;;  %v112_v6 = vld [vmem:[%s2159_s0 + $0x28] sm:$0x7f] }
   0x4   :  { %13 = vst [vmem:[#allocation2 + $0x28] sm:$0xff] %v1600_v0  ;;  %17 = vst [vmem:[#allocation2 + $0x40] sm:$0xff] %v1600_v0  ;;  %v113_v7 = vld [vmem:[%s2159_s0 + $0x30] sm:$0x7f]  ;;  %v114_v8 = vld [vmem:[%s2159_s0 + $0x38] sm:$0x7f] }
   0x5   :  { %18 = vst [vmem:[#allocation2 + $0x48] sm:$0xff] %v1600_v0  ;;  %19 = vst [vmem:[#allocation2 + $0x50] sm:$0xff] %v1600_v0  ;;  %v115_v9 = vld [vmem:[%s2159_s0 + $0x40] sm:$0x7f]  ;;  %v116_v10 = vld [vmem:[%s2159_s0 + $0x48] sm:$0x7f] }
   0x6   :  { %20 = vst [vmem:[#allocation2 + $0x58] sm:$0xff] %v1600_v0  ;;  %21 = vst [vmem:[#allocation2 + $0x60] sm:$0xff] %v1600_v0  ;;  %v117_v11 = vld [vmem:[%s2159_s0 + $0x50] sm:$0x7f]  ;;  %v118_v12 = vld [vmem:[%s2159_s0 + $0x58] sm:$0x7f] }
   0x7   :  { %23 = vst [vmem:[#allocation2 + $0x70] sm:$0xff] %v1600_v0  ;;  %24 = vst [vmem:[#allocation2 + $0x78] sm:$0xff] %v1600_v0  ;;  %v119_v13 = vld [vmem:[%s2159_s0 + $0x60] sm:$0x7f]  ;;  %v120_v14 = vld [vmem:[%s2159_s0 + $0x68] sm:$0x7f] }
   0x8   :  { %25 = vst [vmem:[#allocation2 + $0x80] sm:$0xff] %v1600_v0  ;;  %26 = vst [vmem:[#allocation2 + $0x88] sm:$0xff] %v1600_v0  ;;  %v121_v15 = vld [vmem:[%s2159_s0 + $0x70] sm:$0x7f]  ;;  %v122_v16 = vld [vmem:[%s2159_s0 + $0x78] sm:$0x7f] }
   0x9   :  { %27 = vst [vmem:[#allocation2 + $0x90] sm:$0xff] %v1600_v0  ;;  %28 = vst [vmem:[#allocation2 + $0x98] sm:$0xff] %v1600_v0  ;;  %v123_v17 = vld [vmem:[%s2159_s0 + $0x80] sm:$0x7f]  ;;  %v124_v18 = vld [vmem:[%s2159_s0 + $0x88] sm:$0x7f] }
   0xa   :  { %30 = vst [vmem:[#allocation2 + $0xa8] sm:$0xff] %v1600_v0  ;;  %31 = vst [vmem:[#allocation2 + $0xb0] sm:$0xff] %v1600_v0  ;;  %v125_v19 = vld [vmem:[%s2159_s0 + $0x90] sm:$0x7f]  ;;  %v126_v20 = vld [vmem:[%s2159_s0 + $0x98] sm:$0x7f] }
   0xb   :  { %32 = vst [vmem:[#allocation2 + $0xb8] sm:$0xff] %v1600_v0  ;;  %33 = vst [vmem:[#allocation2 + $0xc0] sm:$0xff] %v1600_v0  ;;  %v127_v21 = vld [vmem:[%s2159_s0 + $0xa0] sm:$0x7f]  ;;  %v128_v22 = vld [vmem:[%s2159_s0 + $0xa8] sm:$0x7f] }
   0xc   :  { %34 = vst [vmem:[#allocation2 + $0xc8] sm:$0xff] %v1600_v0  ;;  %35 = vst [vmem:[#allocation2 + $0xd0] sm:$0xff] %v1600_v0  ;;  %v129_v23 = vld [vmem:[%s2159_s0 + $0xb0] sm:$0x7f]  ;;  %v130_v24 = vld [vmem:[%s2159_s0 + $0xb8] sm:$0x7f] }
   0xd   :  { %37 = vst [vmem:[#allocation2 + $0xe0] sm:$0xff] %v1600_v0  ;;  %38 = vst [vmem:[#allocation2 + $0xe8] sm:$0xff] %v1600_v0  ;;  %v131_v25 = vld [vmem:[%s2159_s0 + $0xc0] sm:$0x7f]  ;;  %v132_v26 = vld [vmem:[%s2159_s0 + $0xc8] sm:$0x7f] }
   0xe   :  { %39 = vst [vmem:[#allocation2 + $0xf0] sm:$0xff] %v1600_v0  ;;  %40 = vst [vmem:[#allocation2 + $0xf8] sm:$0xff] %v1600_v0  ;;  %v133_v27 = vld [vmem:[%s2159_s0 + $0xd0] sm:$0x7f]  ;;  %v134_v28 = vld [vmem:[%s2159_s0 + $0xd8] sm:$0x7f] }
   0xf   :  { %41 = vst [vmem:[#allocation2 + $0x100] sm:$0xff] %v1600_v0  ;;  %42 = vst [vmem:[#allocation2 + $0x108] sm:$0xff] %v1600_v0  ;;  %v135_v29 = vld [vmem:[%s2159_s0 + $0xe0] sm:$0x7f]  ;;  %v136_v30 = vld [vmem:[%s2159_s0 + $0xe8] sm:$0x7f] }
  0x10   :  { %44 = vst [vmem:[#allocation2 + $0x118] sm:$0xff] %v1600_v0  ;;  %45 = vst [vmem:[#allocation2 + $0x120] sm:$0xff] %v1600_v0  ;;  %v137_v31 = vld [vmem:[%s2159_s0 + $0xf0] sm:$0x7f]  ;;  %v138_v32 = vld [vmem:[%s2159_s0 + $0xf8] sm:$0x7f] }
  0x11   :  { %46 = vst [vmem:[#allocation2 + $0x128] sm:$0xff] %v1600_v0  ;;  %47 = vst [vmem:[#allocation2 + $0x130] sm:$0xff] %v1600_v0  ;;  %v139_v33 = vld [vmem:[%s2159_s0 + $0x100] sm:$0x7f]  ;;  %v140_v34 = vld [vmem:[%s2159_s0 + $0x108] sm:$0x7f] }
  0x12   :  { %48 = vst [vmem:[#allocation2 + $0x138] sm:$0xff] %v1600_v0  ;;  %49 = vst [vmem:[#allocation2 + $0x140] sm:$0xff] %v1600_v0  ;;  %v141_v35 = vld [vmem:[%s2159_s0 + $0x110] sm:$0x7f]  ;;  %v142_v36 = vld [vmem:[%s2159_s0 + $0x118] sm:$0x7f] }
  0x13   :  { %51 = vst [vmem:[#allocation2 + $0x150] sm:$0xff] %v1600_v0  ;;  %52 = vst [vmem:[#allocation2 + $0x158] sm:$0xff] %v1600_v0  ;;  %v143_v37 = vld [vmem:[%s2159_s0 + $0x120] sm:$0x7f]  ;;  %v144_v38 = vld [vmem:[%s2159_s0 + $0x128] sm:$0x7f] }
  0x14   :  { %53 = vst [vmem:[#allocation2 + $0x160] sm:$0xff] %v1600_v0  ;;  %54 = vst [vmem:[#allocation2 + $0x168] sm:$0xff] %v1600_v0  ;;  %v145_v39 = vld [vmem:[%s2159_s0 + $0x130] sm:$0x7f]  ;;  %v146_v40 = vld [vmem:[%s2159_s0 + $0x138] sm:$0x7f] }
  0x15   :  { %55 = vst [vmem:[#allocation2 + $0x170] sm:$0xff] %v1600_v0  ;;  %56 = vst [vmem:[#allocation2 + $0x178] sm:$0xff] %v1600_v0  ;;  %v147_v41 = vld [vmem:[%s2159_s0 + $0x140] sm:$0x7f]  ;;  %v148_v42 = vld [vmem:[%s2159_s0 + $0x148] sm:$0x7f] }
  0x16   :  { %58 = vst [vmem:[#allocation2 + $0x188] sm:$0xff] %v1600_v0  ;;  %59 = vst [vmem:[#allocation2 + $0x190] sm:$0xff] %v1600_v0  ;;  %v149_v43 = vld [vmem:[%s2159_s0 + $0x150] sm:$0x7f]  ;;  %v150_v44 = vld [vmem:[%s2159_s0 + $0x158] sm:$0x7f] }
  0x17   :  { %60 = vst [vmem:[#allocation2 + $0x198] sm:$0xff] %v1600_v0  ;;  %61 = vst [vmem:[#allocation2 + $0x1a0] sm:$0xff] %v1600_v0  ;;  %v151_v45 = vld [vmem:[%s2159_s0 + $0x160] sm:$0x7f]  ;;  %v152_v46 = vld [vmem:[%s2159_s0 + $0x168] sm:$0x7f] }
  0x18   :  { %62 = vst [vmem:[#allocation2 + $0x1a8] sm:$0xff] %v1600_v0  ;;  %63 = vst [vmem:[#allocation2 + $0x1b0] sm:$0xff] %v1600_v0  ;;  %v153_v47 = vld [vmem:[%s2159_s0 + $0x170] sm:$0x7f]  ;;  %v154_v48 = vld [vmem:[%s2159_s0 + $0x178] sm:$0x7f] }
  0x19   :  { %65 = vst [vmem:[#allocation2 + $0x1c0] sm:$0xff] %v1600_v0  ;;  %66 = vst [vmem:[#allocation2 + $0x1c8] sm:$0xff] %v1600_v0  ;;  %v155_v49 = vld [vmem:[%s2159_s0 + $0x180] sm:$0x7f]  ;;  %v206_v50 = vld [vmem:[#allocation2] sm:$0x80] }
  0x1a   :  { %67 = vst [vmem:[#allocation2 + $0x1d0] sm:$0xff] %v1600_v0  ;;  %68 = vst [vmem:[#allocation2 + $0x1d8] sm:$0xff] %v1600_v0  ;;  %v207_v54 = vld [vmem:[#allocation2 + $0x8] sm:$0x80]  ;;  %v208_v63 = vld [vmem:[#allocation2 + $0x10] sm:$0x80] }
  0x1b   :  { %69 = vst [vmem:[#allocation2 + $0x1e0] sm:$0xff] %v1600_v0  ;;  %70 = vst [vmem:[#allocation2 + $0x1e8] sm:$0xff] %v1600_v0 }
  0x1c   :  { %72 = vst [vmem:[#allocation2 + $0x1f8] sm:$0xff] %v1600_v0  ;;  %73 = vst [vmem:[#allocation2 + $0x200] sm:$0xff] %v1600_v0 }
  0x1d   :  { %74 = vst [vmem:[#allocation2 + $0x208] sm:$0xff] %v1600_v0  ;;  %75 = vst [vmem:[#allocation2 + $0x210] sm:$0xff] %v1600_v0 }
  0x1e   :  { %76 = vst [vmem:[#allocation2 + $0x218] sm:$0xff] %v1600_v0  ;;  %77 = vst [vmem:[#allocation2 + $0x220] sm:$0xff] %v1600_v0 }
  0x1f   :  { %79 = vst [vmem:[#allocation2 + $0x230] sm:$0xff] %v1600_v0  ;;  %80 = vst [vmem:[#allocation2 + $0x238] sm:$0xff] %v1600_v0 }
  0x20   :  { %81 = vst [vmem:[#allocation2 + $0x240] sm:$0xff] %v1600_v0  ;;  %82 = vst [vmem:[#allocation2 + $0x248] sm:$0xff] %v1600_v0 }
  0x21   :  { %83 = vst [vmem:[#allocation2 + $0x250] sm:$0xff] %v1600_v0  ;;  %84 = vst [vmem:[#allocation2 + $0x258] sm:$0xff] %v1600_v0 }
  0x22   :  { %86 = vst [vmem:[#allocation2 + $0x268] sm:$0xff] %v1600_v0  ;;  %87 = vst [vmem:[#allocation2 + $0x270] sm:$0xff] %v1600_v0 }
  0x23   :  { %88 = vst [vmem:[#allocation2 + $0x278] sm:$0xff] %v1600_v0  ;;  %89 = vst [vmem:[#allocation2 + $0x280] sm:$0xff] %v1600_v0 }
  0x24   :  { %90 = vst [vmem:[#allocation2 + $0x288] sm:$0xff] %v1600_v0  ;;  %91 = vst [vmem:[#allocation2 + $0x290] sm:$0xff] %v1600_v0 }
  0x25   :  { %93 = vst [vmem:[#allocation2 + $0x2a0] sm:$0xff] %v1600_v0  ;;  %94 = vst [vmem:[#allocation2 + $0x2a8] sm:$0xff] %v1600_v0 }
  0x26   :  { %95 = vst [vmem:[#allocation2 + $0x2b0] sm:$0xff] %v1600_v0  ;;  %96 = vst [vmem:[#allocation2 + $0x2b8] sm:$0xff] %v1600_v0 }
  0x27   :  { %97 = vst [vmem:[#allocation2 + $0x2c0] sm:$0xff] %v1600_v0  ;;  %98 = vst [vmem:[#allocation2 + $0x2c8] sm:$0xff] %v1600_v0 }
  0x28   :  { %100 = vst [vmem:[#allocation2 + $0x2d8] sm:$0xff] %v1600_v0  ;;  %101 = vst [vmem:[#allocation2 + $0x2e0] sm:$0xff] %v1600_v0 }
  0x29   :  { %102 = vst [vmem:[#allocation2 + $0x2e8] sm:$0xff] %v1600_v0  ;;  %103 = vst [vmem:[#allocation2 + $0x2f0] sm:$0xff] %v1600_v0 }
  0x2a   :  { %104 = vst [vmem:[#allocation2 + $0x2f8] sm:$0xff] %v1600_v0  ;;  %105 = vst [vmem:[#allocation2 + $0x300] sm:$0xff] %v1600_v0 }
  0x2b   :  { %892 = vst [vmem:[#allocation3] sm:$0x7f] %v1600_v0  ;;  %893 = vst [vmem:[#allocation3 + $0x8] sm:$0x7f] %v1600_v0 }
  0x2c   :  { %894 = vst [vmem:[#allocation3 + $0x10] sm:$0x7f] %v1600_v0  ;;  %895 = vst [vmem:[#allocation3 + $0x18] sm:$0x7f] %v1600_v0 }
  0x2d   :  { %896 = vst [vmem:[#allocation3 + $0x20] sm:$0x7f] %v1600_v0  ;;  %897 = vst [vmem:[#allocation3 + $0x28] sm:$0x7f] %v1600_v0 }
  0x2e   :  { %899 = vst [vmem:[#allocation3 + $0x38] sm:$0x7f] %v1600_v0  ;;  %900 = vst [vmem:[#allocation3 + $0x40] sm:$0x7f] %v1600_v0 }
  0x2f   :  { %901 = vst [vmem:[#allocation3 + $0x48] sm:$0x7f] %v1600_v0  ;;  %902 = vst [vmem:[#allocation3 + $0x50] sm:$0x7f] %v1600_v0 }
  0x30   :  { %903 = vst [vmem:[#allocation3 + $0x58] sm:$0x7f] %v1600_v0  ;;  %904 = vst [vmem:[#allocation3 + $0x60] sm:$0x7f] %v1600_v0 }
  0x31   :  { %906 = vst [vmem:[#allocation3 + $0x70] sm:$0x7f] %v1600_v0  ;;  %907 = vst [vmem:[#allocation3 + $0x78] sm:$0x7f] %v1600_v0 }
  0x32   :  { %908 = vst [vmem:[#allocation3 + $0x80] sm:$0x7f] %v1600_v0  ;;  %909 = vst [vmem:[#allocation3 + $0x88] sm:$0x7f] %v1600_v0 }
  0x33   :  { %910 = vst [vmem:[#allocation3 + $0x90] sm:$0x7f] %v1600_v0  ;;  %911 = vst [vmem:[#allocation3 + $0x98] sm:$0x7f] %v1600_v0 }
  0x34   :  { %913 = vst [vmem:[#allocation3 + $0xa8] sm:$0x7f] %v1600_v0  ;;  %914 = vst [vmem:[#allocation3 + $0xb0] sm:$0x7f] %v1600_v0 }
  0x35   :  { %915 = vst [vmem:[#allocation3 + $0xb8] sm:$0x7f] %v1600_v0  ;;  %916 = vst [vmem:[#allocation3 + $0xc0] sm:$0x7f] %v1600_v0 }
  0x36   :  { %917 = vst [vmem:[#allocation3 + $0xc8] sm:$0x7f] %v1600_v0  ;;  %918 = vst [vmem:[#allocation3 + $0xd0] sm:$0x7f] %v1600_v0 }
  0x37   :  { %920 = vst [vmem:[#allocation3 + $0xe0] sm:$0x7f] %v1600_v0  ;;  %921 = vst [vmem:[#allocation3 + $0xe8] sm:$0x7f] %v1600_v0 }
  0x38   :  { %922 = vst [vmem:[#allocation3 + $0xf0] sm:$0x7f] %v1600_v0  ;;  %923 = vst [vmem:[#allocation3 + $0xf8] sm:$0x7f] %v1600_v0 }
  0x39   :  { %924 = vst [vmem:[#allocation3 + $0x100] sm:$0x7f] %v1600_v0  ;;  %925 = vst [vmem:[#allocation3 + $0x108] sm:$0x7f] %v1600_v0 }
  0x3a   :  { %927 = vst [vmem:[#allocation3 + $0x118] sm:$0x7f] %v1600_v0  ;;  %928 = vst [vmem:[#allocation3 + $0x120] sm:$0x7f] %v1600_v0 }
  0x3b   :  { %929 = vst [vmem:[#allocation3 + $0x128] sm:$0x7f] %v1600_v0  ;;  %930 = vst [vmem:[#allocation3 + $0x130] sm:$0x7f] %v1600_v0 }
  0x3c   :  { %931 = vst [vmem:[#allocation3 + $0x138] sm:$0x7f] %v1600_v0  ;;  %932 = vst [vmem:[#allocation3 + $0x140] sm:$0x7f] %v1600_v0 }
  0x3d   :  { %934 = vst [vmem:[#allocation3 + $0x150] sm:$0x7f] %v1600_v0  ;;  %935 = vst [vmem:[#allocation3 + $0x158] sm:$0x7f] %v1600_v0 }
  0x3e   :  { %936 = vst [vmem:[#allocation3 + $0x160] sm:$0x7f] %v1600_v0  ;;  %937 = vst [vmem:[#allocation3 + $0x168] sm:$0x7f] %v1600_v0 }
  0x3f   :  { %938 = vst [vmem:[#allocation3 + $0x170] sm:$0x7f] %v1600_v0  ;;  %939 = vst [vmem:[#allocation3 + $0x178] sm:$0x7f] %v1600_v0 }
  0x40   :  { %941 = vst [vmem:[#allocation3 + $0x188] sm:$0x7f] %v1600_v0  ;;  %942 = vst [vmem:[#allocation3 + $0x190] sm:$0x7f] %v1600_v0 }
  0x41   :  { %943 = vst [vmem:[#allocation3 + $0x198] sm:$0x7f] %v1600_v0  ;;  %944 = vst [vmem:[#allocation3 + $0x1a0] sm:$0x7f] %v1600_v0 }
  0x42   :  { %945 = vst [vmem:[#allocation3 + $0x1a8] sm:$0x7f] %v1600_v0  ;;  %946 = vst [vmem:[#allocation3 + $0x1b0] sm:$0x7f] %v1600_v0 }
  0x43   :  { %948 = vst [vmem:[#allocation3 + $0x1c0] sm:$0x7f] %v1600_v0  ;;  %949 = vst [vmem:[#allocation3 + $0x1c8] sm:$0x7f] %v1600_v0 }
  0x44   :  { %950 = vst [vmem:[#allocation3 + $0x1d0] sm:$0x7f] %v1600_v0  ;;  %951 = vst [vmem:[#allocation3 + $0x1d8] sm:$0x7f] %v1600_v0 }
  0x45   :  { %952 = vst [vmem:[#allocation3 + $0x1e0] sm:$0x7f] %v1600_v0  ;;  %953 = vst [vmem:[#allocation3 + $0x1e8] sm:$0x7f] %v1600_v0 }
  0x46   :  { %22 = vst.msk [vmem:[#allocation2 + $0x68] sm:$0xff] %vm14_vm0, %v1600_v0  ;;  %15 = vst.msk [vmem:[#allocation2 + $0x30] sm:$0xff] %vm14_vm0, %v1600_v0 }
  0x47   :  { %29 = vst.msk [vmem:[#allocation2 + $0xa0] sm:$0xff] %vm14_vm0, %v1600_v0  ;;  %36 = vst.msk [vmem:[#allocation2 + $0xd8] sm:$0xff] %vm14_vm0, %v1600_v0 }
  0x48   :  { %43 = vst.msk [vmem:[#allocation2 + $0x110] sm:$0xff] %vm14_vm0, %v1600_v0  ;;  %50 = vst.msk [vmem:[#allocation2 + $0x148] sm:$0xff] %vm14_vm0, %v1600_v0 }
  0x49   :  { %57 = vst.msk [vmem:[#allocation2 + $0x180] sm:$0xff] %vm14_vm0, %v1600_v0  ;;  %64 = vst.msk [vmem:[#allocation2 + $0x1b8] sm:$0xff] %vm14_vm0, %v1600_v0 }
  0x4a   :  { %71 = vst.msk [vmem:[#allocation2 + $0x1f0] sm:$0xff] %vm14_vm0, %v1600_v0  ;;  %78 = vst.msk [vmem:[#allocation2 + $0x228] sm:$0xff] %vm14_vm0, %v1600_v0 }
  0x4b   :  { %85 = vst.msk [vmem:[#allocation2 + $0x260] sm:$0xff] %vm14_vm0, %v1600_v0  ;;  %92 = vst.msk [vmem:[#allocation2 + $0x298] sm:$0xff] %vm14_vm0, %v1600_v0 }
  0x4c   :  { %99 = vst.msk [vmem:[#allocation2 + $0x2d0] sm:$0xff] %vm14_vm0, %v1600_v0  ;;  %106 = vst.msk [vmem:[#allocation2 + $0x308] sm:$0xff] %vm14_vm0, %v1600_v0 }
  0x4d   :  { %898 = vst.msk [vmem:[#allocation3 + $0x30] sm:$0x7f] %vm162_vm1, %v1600_v0  ;;  %905 = vst.msk [vmem:[#allocation3 + $0x68] sm:$0x7f] %vm162_vm1, %v1600_v0 }
  0x4e   :  { %912 = vst.msk [vmem:[#allocation3 + $0xa0] sm:$0x7f] %vm162_vm1, %v1600_v0  ;;  %919 = vst.msk [vmem:[#allocation3 + $0xd8] sm:$0x7f] %vm162_vm1, %v1600_v0 }
  0x4f   :  { %926 = vst.msk [vmem:[#allocation3 + $0x110] sm:$0x7f] %vm162_vm1, %v1600_v0  ;;  %933 = vst.msk [vmem:[#allocation3 + $0x148] sm:$0x7f] %vm162_vm1, %v1600_v0 }
  0x50   :  { %940 = vst.msk [vmem:[#allocation3 + $0x180] sm:$0x7f] %vm162_vm1, %v1600_v0  ;;  %947 = vst.msk [vmem:[#allocation3 + $0x1b8] sm:$0x7f] %vm162_vm1, %v1600_v0 }
  0x51   :  { %954 = vst.msk [vmem:[#allocation3 + $0x1f0] sm:$0x7f] %vm162_vm1, %v1600_v0  ;;  %156 = vst [vmem:[#allocation2 + $0x38] sm:$0x7f] %v107_v1 }
  0x52   :  { %157 = vst [vmem:[#allocation2 + $0x40] sm:$0x7f] %v108_v2  ;;  %158 = vst [vmem:[#allocation2 + $0x48] sm:$0x7f] %v109_v3 }
  0x53   :  { %159 = vst [vmem:[#allocation2 + $0x50] sm:$0x7f] %v110_v4  ;;  %160 = vst [vmem:[#allocation2 + $0x58] sm:$0x7f] %v111_v5 }
  0x54   :  { %161 = vst [vmem:[#allocation2 + $0x60] sm:$0x7f] %v112_v6  ;;  %163 = vst.msk [vmem:[#allocation2 + $0x68] sm:$0x7f] %vm162_vm1, %v113_v7 }
  0x55   :  { %164 = vst [vmem:[#allocation2 + $0xa8] sm:$0x7f] %v114_v8  ;;  %165 = vst [vmem:[#allocation2 + $0xb0] sm:$0x7f] %v115_v9 }
  0x56   :  { %166 = vst [vmem:[#allocation2 + $0xb8] sm:$0x7f] %v116_v10  ;;  %167 = vst [vmem:[#allocation2 + $0xc0] sm:$0x7f] %v117_v11 }
  0x57   :  { %168 = vst [vmem:[#allocation2 + $0xc8] sm:$0x7f] %v118_v12  ;;  %169 = vst [vmem:[#allocation2 + $0xd0] sm:$0x7f] %v119_v13 }
  0x58   :  { %170 = vst.msk [vmem:[#allocation2 + $0xd8] sm:$0x7f] %vm162_vm1, %v120_v14  ;;  %171 = vst [vmem:[#allocation2 + $0x118] sm:$0x7f] %v121_v15  ;;  %v304_v51 = vld [vmem:[#allocation2 + $0x38] sm:$0x7f] }
  0x59   :  { %172 = vst [vmem:[#allocation2 + $0x120] sm:$0x7f] %v122_v16  ;;  %173 = vst [vmem:[#allocation2 + $0x128] sm:$0x7f] %v123_v17  ;;  %v598_v52 = vld [vmem:[#allocation2 + $0x38] sm:$0xfe] }
  0x5a   :  { %174 = vst [vmem:[#allocation2 + $0x130] sm:$0x7f] %v124_v18  ;;  %175 = vst [vmem:[#allocation2 + $0x138] sm:$0x7f] %v125_v19  ;;  %v402_v53 = vrot.slane %v304_v51, 1  ;;  %v696_v57 = vrot.slane %v598_v52, 2 }
  0x5b   :  { %176 = vst [vmem:[#allocation2 + $0x140] sm:$0x7f] %v126_v20  ;;  %177 = vst.msk [vmem:[#allocation2 + $0x148] sm:$0x7f] %vm162_vm1, %v127_v21  ;;  %v305_v55 = vld [vmem:[#allocation2 + $0x40] sm:$0x7f] }
  0x5c   :  { %178 = vst [vmem:[#allocation2 + $0x188] sm:$0x7f] %v128_v22  ;;  %179 = vst [vmem:[#allocation2 + $0x190] sm:$0x7f] %v129_v23  ;;  %v213_v56 = vld [vmem:[#allocation2 + $0x38] sm:$0x3f]  ;;  %v500_v60 = vmax.f32 %v206_v50, %v402_v53 }
  0x5d   :  { %180 = vst [vmem:[#allocation2 + $0x198] sm:$0x7f] %v130_v24  ;;  %181 = vst [vmem:[#allocation2 + $0x1a0] sm:$0x7f] %v131_v25  ;;  %v403_v58 = vrot.slane %v305_v55, 1  ;;  %v507_v61 = vmax.f32 %v213_v56, %v402_v53 }
  0x5e   :  { %182 = vst [vmem:[#allocation2 + $0x1a8] sm:$0x7f] %v132_v26  ;;  %183 = vst [vmem:[#allocation2 + $0x1b0] sm:$0x7f] %v133_v27  ;;  %v599_v59 = vld [vmem:[#allocation2 + $0x40] sm:$0xfe]  ;;  %v794_v6 = vmax.f32 %v500_v60, %v696_v57 }
  0x5f   :  { %184 = vst.msk [vmem:[#allocation2 + $0x1b8] sm:$0x7f] %vm162_vm1, %v134_v28  ;;  %185 = vst [vmem:[#allocation2 + $0x1f8] sm:$0x7f] %v135_v29  ;;  %v214_v62 = vld [vmem:[#allocation2 + $0x40] sm:$0x3f]  ;;  %v501_v1 = vmax.f32 %v207_v54, %v403_v58  ;;  %v801_v7 = vmax.f32 %v507_v61, %v696_v57 }
  0x60   :  { %186 = vst [vmem:[#allocation2 + $0x200] sm:$0x7f] %v136_v30  ;;  %187 = vst [vmem:[#allocation2 + $0x208] sm:$0x7f] %v137_v31  ;;  %v306_v0 = vld [vmem:[#allocation2 + $0x48] sm:$0x7f]  ;;  %v508_v2 = vmax.f32 %v214_v62, %v403_v58 }
  0x61   :  { %188 = vst [vmem:[#allocation2 + $0x210] sm:$0x7f] %v138_v32  ;;  %189 = vst [vmem:[#allocation2 + $0x218] sm:$0x7f] %v139_v33  ;;  %v697_v3 = vrot.slane %v599_v59, 2  ;;  %v404_v4 = vrot.slane %v306_v0, 1 }
  0x62   :  { %190 = vst [vmem:[#allocation2 + $0x220] sm:$0x7f] %v140_v34  ;;  %191 = vst.msk [vmem:[#allocation2 + $0x228] sm:$0x7f] %vm162_vm1, %v141_v35  ;;  %v600_v5 = vld [vmem:[#allocation2 + $0x48] sm:$0xfe] }
  0x63   :  { %192 = vst [vmem:[#allocation2 + $0x268] sm:$0x7f] %v142_v36  ;;  %193 = vst [vmem:[#allocation2 + $0x270] sm:$0x7f] %v143_v37  ;;  %v215_v8 = vld [vmem:[#allocation2 + $0x48] sm:$0x3f]  ;;  %v795_v11 = vmax.f32 %v501_v1, %v697_v3  ;;  %v802_v12 = vmax.f32 %v508_v2, %v697_v3  ;;  %v502_v13 = vmax.f32 %v208_v63, %v404_v4 }
  0x64   :  { %194 = vst [vmem:[#allocation2 + $0x278] sm:$0x7f] %v144_v38  ;;  %195 = vst [vmem:[#allocation2 + $0x280] sm:$0x7f] %v145_v39  ;;  %v698_v9 = vrot.slane %v600_v5, 2  ;;  %v509_v14 = vmax.f32 %v215_v8, %v404_v4  ;;  %v1054_v18 = vrot.slane %v794_v6, 7 }
  0x65   :  { %196 = vst [vmem:[#allocation2 + $0x288] sm:$0x7f] %v146_v40  ;;  %197 = vst [vmem:[#allocation2 + $0x290] sm:$0x7f] %v147_v41  ;;  %v307_v10 = vld [vmem:[#allocation2 + $0x50] sm:$0x7f] }
  0x66   :  { %198 = vst.msk [vmem:[#allocation2 + $0x298] sm:$0x7f] %vm162_vm1, %v148_v42  ;;  %199 = vst [vmem:[#allocation2 + $0x2d8] sm:$0x7f] %v149_v43  ;;  %v209_v15 = vld [vmem:[#allocation2 + $0x18] sm:$0x80]  ;;  %v796_v25 = vmax.f32 %v502_v13, %v698_v9  ;;  %v803_v26 = vmax.f32 %v509_v14, %v698_v9 }
  0x67   :  { %200 = vst [vmem:[#allocation2 + $0x2e0] sm:$0x7f] %v150_v44  ;;  %201 = vst [vmem:[#allocation2 + $0x2e8] sm:$0x7f] %v151_v45  ;;  %v216_v16 = vld [vmem:[#allocation2 + $0x50] sm:$0x3f] }
  0x68   :  { %202 = vst [vmem:[#allocation2 + $0x2f0] sm:$0x7f] %v152_v46  ;;  %203 = vst [vmem:[#allocation2 + $0x2f8] sm:$0x7f] %v153_v47  ;;  %v601_v17 = vld [vmem:[#allocation2 + $0x50] sm:$0xfe] }
  0x69   :  { %204 = vst [vmem:[#allocation2 + $0x300] sm:$0x7f] %v154_v48  ;;  %205 = vst.msk [vmem:[#allocation2 + $0x308] sm:$0x7f] %vm162_vm1, %v155_v49  ;;  %v1055_v19 = vrot.slane %v801_v7, 7  ;;  %v405_v20 = vrot.slane %v307_v10, 1 }
  0x6a   :  { %v699_v21 = vrot.slane %v601_v17, 2  ;;  %v308_v22 = vld [vmem:[#allocation2 + $0x58] sm:$0x7f]  ;;  %v1057_v23 = vrot.slane %v795_v11, 7  ;;  %v1058_v24 = vrot.slane %v802_v12, 7  ;;  %v1060_v36 = vrot.slane %v796_v25, 7 }
  0x6b   :  { %v210_v27 = vld [vmem:[#allocation2 + $0x20] sm:$0x80]  ;;  %v602_v28 = vld [vmem:[#allocation2 + $0x58] sm:$0xfe]  ;;  %v1056_v29 = vsel %vm1053_vm2, %v1054_v18, %v1055_v19  ;;  %v503_v30 = vmax.f32 %v209_v15, %v405_v20  ;;  %v510_v31 = vmax.f32 %v216_v16, %v405_v20  ;;  %v406_v33 = vrot.slane %v308_v22, 1 }
  0x6c   :  { %v217_v32 = vld [vmem:[#allocation2 + $0x58] sm:$0x3f]  ;;  %v309_v34 = vld [vmem:[#allocation2 + $0x60] sm:$0x7f]  ;;  %1251 = vst [vmem:[#allocation3 + $0x38] sm:$0x7f] %v1056_v29  ;;  %v1059_v35 = vsel %vm1053_vm2, %v1057_v23, %v1058_v24 }
  0x6d   :  { %v1061_v37 = vrot.slane %v803_v26, 7  ;;  %v700_v38 = vrot.slane %v602_v28, 2  ;;  %v603_v39 = vld [vmem:[#allocation2 + $0x60] sm:$0xfe]  ;;  %1252 = vst [vmem:[#allocation3 + $0x40] sm:$0x7f] %v1059_v35  ;;  %v797_v40 = vmax.f32 %v503_v30, %v699_v21  ;;  %v804_v41 = vmax.f32 %v510_v31, %v699_v21 }
  0x6e   :  { %v504_v42 = vmax.f32 %v210_v27, %v406_v33  ;;  %v511_v43 = vmax.f32 %v217_v32, %v406_v33  ;;  %v211_v44 = vld [vmem:[#allocation2 + $0x28] sm:$0x80]  ;;  %v212_v45 = vld [vmem:[#allocation2 + $0x30] sm:$0x80]  ;;  %v310_v46 = vld [vmem:[#allocation2 + $0x68] sm:$0x7f] }
  0x6f   :  { %v1062_v47 = vsel %vm1053_vm2, %v1060_v36, %v1061_v37  ;;  %v407_v48 = vrot.slane %v309_v34, 1  ;;  %v701_v49 = vrot.slane %v603_v39, 2  ;;  %v408_v50 = vrot.slane %v310_v46, 1  ;;  %v604_v51 = vld [vmem:[#allocation2 + $0x68] sm:$0xfe] }
  0x70   :  { %1253 = vst [vmem:[#allocation3 + $0x48] sm:$0x7f] %v1062_v47  ;;  %v1063_v52 = vrot.slane %v797_v40, 7  ;;  %v1064_v53 = vrot.slane %v804_v41, 7  ;;  %v798_v54 = vmax.f32 %v504_v42, %v700_v38  ;;  %v805_v55 = vmax.f32 %v511_v43, %v700_v38  ;;  %v218_v56 = vld [vmem:[#allocation2 + $0x60] sm:$0x3f] }
  0x71   :  { %v219_v57 = vld [vmem:[#allocation2 + $0x68] sm:$0x3f]  ;;  %v505_v58 = vmax.f32 %v211_v44, %v407_v48  ;;  %v512_v59 = vmax.f32 %v218_v56, %v407_v48  ;;  %v506_v60 = vmax.f32 %v212_v45, %v408_v50  ;;  %v220_v62 = vld [vmem:[#allocation2 + $0x70] sm:$0x80]  ;;  %v702_v4 = vrot.slane %v604_v51, 2 }
  0x72   :  { %v513_v61 = vmax.f32 %v219_v57, %v408_v50  ;;  %v311_v63 = vld [vmem:[#allocation2 + $0xa8] sm:$0x7f]  ;;  %v1065_v1 = vsel %vm1053_vm2, %v1063_v52, %v1064_v53  ;;  %v1066_v2 = vrot.slane %v798_v54, 7  ;;  %v1067_v3 = vrot.slane %v805_v55, 7  ;;  %v221_v10 = vld [vmem:[#allocation2 + $0x78] sm:$0x80] }
  0x73   :  { %v605_v0 = vld [vmem:[#allocation2 + $0xa8] sm:$0xfe]  ;;  %1254 = vst [vmem:[#allocation3 + $0x50] sm:$0x7f] %v1065_v1  ;;  %v799_v6 = vmax.f32 %v505_v58, %v701_v49  ;;  %v806_v7 = vmax.f32 %v512_v59, %v701_v49  ;;  %v409_v8 = vrot.slane %v311_v63, 1  ;;  %v800_v13 = vmax.f32 %v506_v60, %v702_v4 }
  0x74   :  { %v227_v5 = vld [vmem:[#allocation2 + $0xa8] sm:$0x3f]  ;;  %v703_v9 = vrot.slane %v605_v0, 2  ;;  %v312_v11 = vld [vmem:[#allocation2 + $0xb0] sm:$0x7f]  ;;  %v1068_v12 = vsel %vm1053_vm2, %v1066_v2, %v1067_v3  ;;  %v807_v14 = vmax.f32 %v513_v61, %v702_v4 }
  0x75   :  { %v228_v15 = vld [vmem:[#allocation2 + $0xb0] sm:$0x3f]  ;;  %v410_v16 = vrot.slane %v312_v11, 1  ;;  %1255 = vst [vmem:[#allocation3 + $0x58] sm:$0x7f] %v1068_v12  ;;  %v1069_v18 = vrot.slane %v799_v6, 7  ;;  %v514_v20 = vmax.f32 %v220_v62, %v409_v8  ;;  %v521_v21 = vmax.f32 %v227_v5, %v409_v8 }
  0x76   :  { %v606_v17 = vld [vmem:[#allocation2 + $0xb0] sm:$0xfe]  ;;  %v1070_v19 = vrot.slane %v806_v7, 7  ;;  %v313_v22 = vld [vmem:[#allocation2 + $0xb8] sm:$0x7f]  ;;  %v1072_v24 = vrot.slane %v800_v13, 7 }
  0x77   :  { %v607_v23 = vld [vmem:[#allocation2 + $0xb8] sm:$0xfe]  ;;  %v1073_v25 = vrot.slane %v807_v14, 7  ;;  %v515_v26 = vmax.f32 %v221_v10, %v410_v16  ;;  %v522_v27 = vmax.f32 %v228_v15, %v410_v16  ;;  %v222_v28 = vld [vmem:[#allocation2 + $0x80] sm:$0x80]  ;;  %v808_v30 = vmax.f32 %v514_v20, %v703_v9 }
  0x78   :  { %v1071_v29 = vsel %vm1053_vm2, %v1069_v18, %v1070_v19  ;;  %v815_v31 = vmax.f32 %v521_v21, %v703_v9  ;;  %v704_v32 = vrot.slane %v606_v17, 2  ;;  %v229_v33 = vld [vmem:[#allocation2 + $0xb8] sm:$0x3f]  ;;  %v223_v34 = vld [vmem:[#allocation2 + $0x88] sm:$0x80]  ;;  %v411_v37 = vrot.slane %v313_v22, 1 }
  0x79   :  { %v314_v35 = vld [vmem:[#allocation2 + $0xc0] sm:$0x7f]  ;;  %1256 = vst [vmem:[#allocation3 + $0x60] sm:$0x7f] %v1071_v29  ;;  %v1074_v36 = vsel %vm1053_vm2, %v1072_v24, %v1073_v25  ;;  %v705_v38 = vrot.slane %v607_v23, 2  ;;  %v1075_v41 = vrot.slane %v808_v30, 7 }
  0x7a   :  { %v412_v39 = vrot.slane %v314_v35, 1  ;;  %v608_v40 = vld [vmem:[#allocation2 + $0xc0] sm:$0xfe]  ;;  %1257 = vst.msk [vmem:[#allocation3 + $0x68] sm:$0x7f] %vm162_vm1, %v1074_v36  ;;  %v1076_v42 = vrot.slane %v815_v31, 7  ;;  %v809_v43 = vmax.f32 %v515_v26, %v704_v32  ;;  %v816_v44 = vmax.f32 %v522_v27, %v704_v32 }
  0x7b   :  { %v230_v45 = vld [vmem:[#allocation2 + $0xc0] sm:$0x3f]  ;;  %v315_v46 = vld [vmem:[#allocation2 + $0xc8] sm:$0x7f]  ;;  %v516_v47 = vmax.f32 %v222_v28, %v411_v37  ;;  %v523_v48 = vmax.f32 %v229_v33, %v411_v37  ;;  %v224_v51 = vld [vmem:[#allocation2 + $0x90] sm:$0x80] }
  0x7c   :  { %v517_v49 = vmax.f32 %v223_v34, %v412_v39  ;;  %v524_v50 = vmax.f32 %v230_v45, %v412_v39  ;;  %v609_v52 = vld [vmem:[#allocation2 + $0xc8] sm:$0xfe]  ;;  %v1077_v53 = vsel %vm1053_vm2, %v1075_v41, %v1076_v42  ;;  %v1078_v54 = vrot.slane %v809_v43, 7  ;;  %v316_v57 = vld [vmem:[#allocation2 + $0xd0] sm:$0x7f] }
  0x7d   :  { %v1079_v55 = vrot.slane %v816_v44, 7  ;;  %v706_v56 = vrot.slane %v608_v40, 2  ;;  %1258 = vst [vmem:[#allocation3 + $0x70] sm:$0x7f] %v1077_v53  ;;  %v810_v58 = vmax.f32 %v516_v47, %v705_v38  ;;  %v817_v59 = vmax.f32 %v523_v48, %v705_v38  ;;  %v231_v60 = vld [vmem:[#allocation2 + $0xc8] sm:$0x3f] }
  0x7e   :  { %v413_v61 = vrot.slane %v315_v46, 1  ;;  %v707_v62 = vrot.slane %v609_v52, 2  ;;  %v225_v63 = vld [vmem:[#allocation2 + $0x98] sm:$0x80]  ;;  %v232_v3 = vld [vmem:[#allocation2 + $0xd0] sm:$0x3f] }
  0x7f   :  { %v1080_v0 = vsel %vm1053_vm2, %v1078_v54, %v1079_v55  ;;  %v811_v1 = vmax.f32 %v517_v49, %v706_v56  ;;  %v818_v2 = vmax.f32 %v524_v50, %v706_v56  ;;  %v414_v4 = vrot.slane %v316_v57, 1  ;;  %v610_v5 = vld [vmem:[#allocation2 + $0xd0] sm:$0xfe]  ;;  %v317_v10 = vld [vmem:[#allocation2 + $0xd8] sm:$0x7f] }
  0x80   :  { %1259 = vst [vmem:[#allocation3 + $0x78] sm:$0x7f] %v1080_v0  ;;  %v1081_v6 = vrot.slane %v810_v58, 7  ;;  %v1082_v7 = vrot.slane %v817_v59, 7  ;;  %v518_v8 = vmax.f32 %v224_v51, %v413_v61  ;;  %v525_v9 = vmax.f32 %v231_v60, %v413_v61  ;;  %v611_v11 = vld [vmem:[#allocation2 + $0xd8] sm:$0xfe] }
  0x81   :  { %v1084_v12 = vrot.slane %v811_v1, 7  ;;  %v1085_v13 = vrot.slane %v818_v2, 7  ;;  %v519_v14 = vmax.f32 %v225_v63, %v414_v4  ;;  %v526_v15 = vmax.f32 %v232_v3, %v414_v4  ;;  %v226_v16 = vld [vmem:[#allocation2 + $0xa0] sm:$0x80]  ;;  %v318_v17 = vld [vmem:[#allocation2 + $0x118] sm:$0x7f] }
  0x82   :  { %v1083_v18 = vsel %vm1053_vm2, %v1081_v6, %v1082_v7  ;;  %v812_v19 = vmax.f32 %v518_v8, %v707_v62  ;;  %v819_v20 = vmax.f32 %v525_v9, %v707_v62  ;;  %v708_v21 = vrot.slane %v610_v5, 2  ;;  %v233_v22 = vld [vmem:[#allocation2 + $0xd8] sm:$0x3f]  ;;  %v234_v23 = vld [vmem:[#allocation2 + $0xe0] sm:$0x80] }
  0x83   :  { %v241_v24 = vld [vmem:[#allocation2 + $0x118] sm:$0x3f]  ;;  %1260 = vst [vmem:[#allocation3 + $0x80] sm:$0x7f] %v1083_v18  ;;  %v1086_v25 = vsel %vm1053_vm2, %v1084_v12, %v1085_v13  ;;  %v415_v26 = vrot.slane %v317_v10, 1  ;;  %v709_v27 = vrot.slane %v611_v11, 2 }
  0x84   :  { %v416_v28 = vrot.slane %v318_v17, 1  ;;  %v612_v29 = vld [vmem:[#allocation2 + $0x118] sm:$0xfe]  ;;  %1261 = vst [vmem:[#allocation3 + $0x88] sm:$0x7f] %v1086_v25  ;;  %v1087_v30 = vrot.slane %v812_v19, 7  ;;  %v813_v32 = vmax.f32 %v519_v14, %v708_v21  ;;  %v820_v33 = vmax.f32 %v526_v15, %v708_v21 }
  0x85   :  { %v1088_v31 = vrot.slane %v819_v20, 7  ;;  %v319_v34 = vld [vmem:[#allocation2 + $0x120] sm:$0x7f]  ;;  %v520_v36 = vmax.f32 %v226_v16, %v415_v26  ;;  %v527_v37 = vmax.f32 %v233_v22, %v415_v26  ;;  %v320_v40 = vld [vmem:[#allocation2 + $0x128] sm:$0x7f]  ;;  %v710_v44 = vrot.slane %v612_v29, 2 }
  0x86   :  { %v613_v35 = vld [vmem:[#allocation2 + $0x120] sm:$0xfe]  ;;  %v528_v38 = vmax.f32 %v234_v23, %v416_v28  ;;  %v535_v39 = vmax.f32 %v241_v24, %v416_v28  ;;  %v1090_v42 = vrot.slane %v813_v32, 7  ;;  %v1091_v43 = vrot.slane %v820_v33, 7  ;;  %v235_v45 = vld [vmem:[#allocation2 + $0xe8] sm:$0x80] }
  0x87   :  { %v1089_v41 = vsel %vm1053_vm2, %v1087_v30, %v1088_v31  ;;  %v814_v46 = vmax.f32 %v520_v36, %v709_v27  ;;  %v821_v47 = vmax.f32 %v527_v37, %v709_v27  ;;  %v242_v48 = vld [vmem:[#allocation2 + $0x120] sm:$0x3f]  ;;  %v417_v49 = vrot.slane %v319_v34, 1  ;;  %v236_v51 = vld [vmem:[#allocation2 + $0xf0] sm:$0x80] }
  0x88   :  { %1262 = vst [vmem:[#allocation3 + $0x90] sm:$0x7f] %v1089_v41  ;;  %v711_v50 = vrot.slane %v613_v35, 2  ;;  %v1092_v52 = vsel %vm1053_vm2, %v1090_v42, %v1091_v43  ;;  %v822_v53 = vmax.f32 %v528_v38, %v710_v44  ;;  %v829_v54 = vmax.f32 %v535_v39, %v710_v44  ;;  %v243_v55 = vld [vmem:[#allocation2 + $0x128] sm:$0x3f] }
  0x89   :  { %v418_v56 = vrot.slane %v320_v40, 1  ;;  %v614_v57 = vld [vmem:[#allocation2 + $0x128] sm:$0xfe]  ;;  %1263 = vst [vmem:[#allocation3 + $0x98] sm:$0x7f] %v1092_v52  ;;  %v1093_v58 = vrot.slane %v814_v46, 7  ;;  %v529_v60 = vmax.f32 %v235_v45, %v417_v49  ;;  %v536_v61 = vmax.f32 %v242_v48, %v417_v49 }
  0x8a   :  { %v1094_v59 = vrot.slane %v821_v47, 7  ;;  %v321_v62 = vld [vmem:[#allocation2 + $0x130] sm:$0x7f]  ;;  %v1096_v0 = vrot.slane %v822_v53, 7  ;;  %v1097_v1 = vrot.slane %v829_v54, 7  ;;  %v712_v9 = vrot.slane %v614_v57, 2 }
  0x8b   :  { %v615_v63 = vld [vmem:[#allocation2 + $0x130] sm:$0xfe]  ;;  %v530_v2 = vmax.f32 %v236_v51, %v418_v56  ;;  %v537_v3 = vmax.f32 %v243_v55, %v418_v56  ;;  %v237_v4 = vld [vmem:[#allocation2 + $0xf8] sm:$0x80]  ;;  %v322_v5 = vld [vmem:[#allocation2 + $0x138] sm:$0x7f]  ;;  %v823_v7 = vmax.f32 %v529_v60, %v711_v50  ;;  %v830_v8 = vmax.f32 %v536_v61, %v711_v50 }
  0x8c   :  { %v1095_v6 = vsel %vm1053_vm2, %v1093_v58, %v1094_v59  ;;  %v244_v10 = vld [vmem:[#allocation2 + $0x130] sm:$0x3f]  ;;  %v238_v11 = vld [vmem:[#allocation2 + $0x100] sm:$0x80]  ;;  %v245_v12 = vld [vmem:[#allocation2 + $0x138] sm:$0x3f]  ;;  %v1098_v13 = vsel %vm1053_vm2, %v1096_v0, %v1097_v1 }
  0x8d   :  { %1264 = vst.msk [vmem:[#allocation3 + $0xa0] sm:$0x7f] %vm162_vm1, %v1095_v6  ;;  %v419_v14 = vrot.slane %v321_v62, 1  ;;  %v713_v15 = vrot.slane %v615_v63, 2  ;;  %v420_v16 = vrot.slane %v322_v5, 1  ;;  %v1099_v18 = vrot.slane %v823_v7, 7 }
  0x8e   :  { %v616_v17 = vld [vmem:[#allocation2 + $0x138] sm:$0xfe]  ;;  %1265 = vst [vmem:[#allocation3 + $0xa8] sm:$0x7f] %v1098_v13  ;;  %v1100_v19 = vrot.slane %v830_v8, 7  ;;  %v824_v20 = vmax.f32 %v530_v2, %v712_v9  ;;  %v831_v21 = vmax.f32 %v537_v3, %v712_v9 }
  0x8f   :  { %v323_v22 = vld [vmem:[#allocation2 + $0x140] sm:$0x7f]  ;;  %v531_v24 = vmax.f32 %v237_v4, %v419_v14  ;;  %v538_v25 = vmax.f32 %v244_v10, %v419_v14  ;;  %v532_v26 = vmax.f32 %v238_v11, %v420_v16  ;;  %v539_v27 = vmax.f32 %v245_v12, %v420_v16  ;;  %v239_v28 = vld [vmem:[#allocation2 + $0x108] sm:$0x80]  ;;  %v324_v29 = vld [vmem:[#allocation2 + $0x148] sm:$0x7f] }
  0x90   :  { %v617_v23 = vld [vmem:[#allocation2 + $0x140] sm:$0xfe]  ;;  %v1101_v30 = vsel %vm1053_vm2, %v1099_v18, %v1100_v19  ;;  %v1102_v31 = vrot.slane %v824_v20, 7  ;;  %v1103_v32 = vrot.slane %v831_v21, 7  ;;  %v714_v33 = vrot.slane %v616_v17, 2 }
  0x91   :  { %v246_v34 = vld [vmem:[#allocation2 + $0x140] sm:$0x3f]  ;;  %1266 = vst [vmem:[#allocation3 + $0xb0] sm:$0x7f] %v1101_v30  ;;  %v825_v35 = vmax.f32 %v531_v24, %v713_v15  ;;  %v832_v36 = vmax.f32 %v538_v25, %v713_v15  ;;  %v421_v37 = vrot.slane %v323_v22, 1  ;;  %v715_v38 = vrot.slane %v617_v23, 2 }
  0x92   :  { %v240_v39 = vld [vmem:[#allocation2 + $0x110] sm:$0x80]  ;;  %v247_v40 = vld [vmem:[#allocation2 + $0x148] sm:$0x3f]  ;;  %v1104_v41 = vsel %vm1053_vm2, %v1102_v31, %v1103_v32  ;;  %v826_v42 = vmax.f32 %v532_v26, %v714_v33  ;;  %v833_v43 = vmax.f32 %v539_v27, %v714_v33  ;;  %v422_v44 = vrot.slane %v324_v29, 1 }
  0x93   :  { %v618_v45 = vld [vmem:[#allocation2 + $0x148] sm:$0xfe]  ;;  %1267 = vst [vmem:[#allocation3 + $0xb8] sm:$0x7f] %v1104_v41  ;;  %v1105_v47 = vrot.slane %v825_v35, 7  ;;  %v1106_v48 = vrot.slane %v832_v36, 7  ;;  %v533_v49 = vmax.f32 %v239_v28, %v421_v37  ;;  %v540_v50 = vmax.f32 %v246_v34, %v421_v37 }
  0x94   :  { %v325_v46 = vld [vmem:[#allocation2 + $0x188] sm:$0x7f]  ;;  %v326_v52 = vld [vmem:[#allocation2 + $0x190] sm:$0x7f]  ;;  %v1108_v53 = vrot.slane %v826_v42, 7  ;;  %v1109_v54 = vrot.slane %v833_v43, 7  ;;  %v534_v55 = vmax.f32 %v240_v39, %v422_v44  ;;  %v541_v56 = vmax.f32 %v247_v40, %v422_v44 }
  0x95   :  { %v619_v51 = vld [vmem:[#allocation2 + $0x188] sm:$0xfe]  ;;  %v248_v57 = vld [vmem:[#allocation2 + $0x150] sm:$0x80]  ;;  %v1107_v58 = vsel %vm1053_vm2, %v1105_v47, %v1106_v48  ;;  %v827_v59 = vmax.f32 %v533_v49, %v715_v38  ;;  %v834_v60 = vmax.f32 %v540_v50, %v715_v38  ;;  %v716_v61 = vrot.slane %v618_v45, 2 }
  0x96   :  { %v255_v62 = vld [vmem:[#allocation2 + $0x188] sm:$0x3f]  ;;  %v249_v63 = vld [vmem:[#allocation2 + $0x158] sm:$0x80]  ;;  %v256_v0 = vld [vmem:[#allocation2 + $0x190] sm:$0x3f]  ;;  %v1110_v1 = vsel %vm1053_vm2, %v1108_v53, %v1109_v54 }
  0x97   :  { %1268 = vst [vmem:[#allocation3 + $0xc0] sm:$0x7f] %v1107_v58  ;;  %v423_v2 = vrot.slane %v325_v46, 1  ;;  %v717_v3 = vrot.slane %v619_v51, 2  ;;  %v424_v4 = vrot.slane %v326_v52, 1  ;;  %v1111_v6 = vrot.slane %v827_v59, 7 }
  0x98   :  { %v620_v5 = vld [vmem:[#allocation2 + $0x190] sm:$0xfe]  ;;  %1269 = vst [vmem:[#allocation3 + $0xc8] sm:$0x7f] %v1110_v1  ;;  %v1112_v7 = vrot.slane %v834_v60, 7  ;;  %v828_v8 = vmax.f32 %v534_v55, %v716_v61  ;;  %v835_v9 = vmax.f32 %v541_v56, %v716_v61 }
  0x99   :  { %v327_v10 = vld [vmem:[#allocation2 + $0x198] sm:$0x7f]  ;;  %v542_v12 = vmax.f32 %v248_v57, %v423_v2  ;;  %v549_v13 = vmax.f32 %v255_v62, %v423_v2  ;;  %v543_v14 = vmax.f32 %v249_v63, %v424_v4  ;;  %v550_v15 = vmax.f32 %v256_v0, %v424_v4  ;;  %v250_v16 = vld [vmem:[#allocation2 + $0x160] sm:$0x80]  ;;  %v328_v17 = vld [vmem:[#allocation2 + $0x1a0] sm:$0x7f] }
  0x9a   :  { %v621_v11 = vld [vmem:[#allocation2 + $0x198] sm:$0xfe]  ;;  %v1113_v18 = vsel %vm1053_vm2, %v1111_v6, %v1112_v7  ;;  %v1114_v19 = vrot.slane %v828_v8, 7  ;;  %v1115_v20 = vrot.slane %v835_v9, 7  ;;  %v718_v21 = vrot.slane %v620_v5, 2 }
  0x9b   :  { %v257_v22 = vld [vmem:[#allocation2 + $0x198] sm:$0x3f]  ;;  %1270 = vst [vmem:[#allocation3 + $0xd0] sm:$0x7f] %v1113_v18  ;;  %v836_v23 = vmax.f32 %v542_v12, %v717_v3  ;;  %v843_v24 = vmax.f32 %v549_v13, %v717_v3  ;;  %v425_v25 = vrot.slane %v327_v10, 1  ;;  %v719_v26 = vrot.slane %v621_v11, 2 }
  0x9c   :  { %v251_v27 = vld [vmem:[#allocation2 + $0x168] sm:$0x80]  ;;  %v258_v28 = vld [vmem:[#allocation2 + $0x1a0] sm:$0x3f]  ;;  %v1116_v29 = vsel %vm1053_vm2, %v1114_v19, %v1115_v20  ;;  %v837_v30 = vmax.f32 %v543_v14, %v718_v21  ;;  %v844_v31 = vmax.f32 %v550_v15, %v718_v21  ;;  %v426_v32 = vrot.slane %v328_v17, 1 }
  0x9d   :  { %v622_v33 = vld [vmem:[#allocation2 + $0x1a0] sm:$0xfe]  ;;  %v329_v34 = vld [vmem:[#allocation2 + $0x1a8] sm:$0x7f]  ;;  %1271 = vst.msk [vmem:[#allocation3 + $0xd8] sm:$0x7f] %vm162_vm1, %v1116_v29  ;;  %v544_v37 = vmax.f32 %v250_v16, %v425_v25  ;;  %v551_v38 = vmax.f32 %v257_v22, %v425_v25 }
  0x9e   :  { %v1117_v35 = vrot.slane %v836_v23, 7  ;;  %v1118_v36 = vrot.slane %v843_v24, 7  ;;  %v623_v39 = vld [vmem:[#allocation2 + $0x1a8] sm:$0xfe]  ;;  %v330_v40 = vld [vmem:[#allocation2 + $0x1b0] sm:$0x7f]  ;;  %v545_v43 = vmax.f32 %v251_v27, %v426_v32  ;;  %v552_v44 = vmax.f32 %v258_v28, %v426_v32 }
  0x9f   :  { %v1120_v41 = vrot.slane %v837_v30, 7  ;;  %v1121_v42 = vrot.slane %v844_v31, 7  ;;  %v252_v45 = vld [vmem:[#allocation2 + $0x170] sm:$0x80]  ;;  %v838_v47 = vmax.f32 %v544_v37, %v719_v26  ;;  %v845_v48 = vmax.f32 %v551_v38, %v719_v26  ;;  %v259_v50 = vld [vmem:[#allocation2 + $0x1a8] sm:$0x3f] }
  0xa0   :  { %v1119_v46 = vsel %vm1053_vm2, %v1117_v35, %v1118_v36  ;;  %v720_v49 = vrot.slane %v622_v33, 2  ;;  %v253_v51 = vld [vmem:[#allocation2 + $0x178] sm:$0x80]  ;;  %v260_v52 = vld [vmem:[#allocation2 + $0x1b0] sm:$0x3f]  ;;  %v427_v54 = vrot.slane %v329_v34, 1 }
  0xa1   :  { %1272 = vst [vmem:[#allocation3 + $0xe0] sm:$0x7f] %v1119_v46  ;;  %v1122_v53 = vsel %vm1053_vm2, %v1120_v41, %v1121_v42  ;;  %v721_v55 = vrot.slane %v623_v39, 2  ;;  %v428_v56 = vrot.slane %v330_v40, 1  ;;  %v624_v57 = vld [vmem:[#allocation2 + $0x1b0] sm:$0xfe] }
  0xa2   :  { %1273 = vst [vmem:[#allocation3 + $0xe8] sm:$0x7f] %v1122_v53  ;;  %v1123_v58 = vrot.slane %v838_v47, 7  ;;  %v1124_v59 = vrot.slane %v845_v48, 7  ;;  %v839_v60 = vmax.f32 %v545_v43, %v720_v49  ;;  %v846_v61 = vmax.f32 %v552_v44, %v720_v49  ;;  %v331_v62 = vld [vmem:[#allocation2 + $0x1b8] sm:$0x7f] }
  0xa3   :  { %v625_v63 = vld [vmem:[#allocation2 + $0x1b8] sm:$0xfe]  ;;  %v546_v0 = vmax.f32 %v252_v45, %v427_v54  ;;  %v553_v1 = vmax.f32 %v259_v50, %v427_v54  ;;  %v547_v2 = vmax.f32 %v253_v51, %v428_v56  ;;  %v554_v3 = vmax.f32 %v260_v52, %v428_v56  ;;  %v254_v4 = vld [vmem:[#allocation2 + $0x180] sm:$0x80]  ;;  %v333_v22 = vld [vmem:[#allocation2 + $0x200] sm:$0x7f] }
  0xa4   :  { %v332_v5 = vld [vmem:[#allocation2 + $0x1f8] sm:$0x7f]  ;;  %v1125_v6 = vsel %vm1053_vm2, %v1123_v58, %v1124_v59  ;;  %v1126_v7 = vrot.slane %v839_v60, 7  ;;  %v1127_v8 = vrot.slane %v846_v61, 7  ;;  %v722_v9 = vrot.slane %v624_v57, 2 }
  0xa5   :  { %v261_v10 = vld [vmem:[#allocation2 + $0x1b8] sm:$0x3f]  ;;  %1274 = vst [vmem:[#allocation3 + $0xf0] sm:$0x7f] %v1125_v6  ;;  %v840_v11 = vmax.f32 %v546_v0, %v721_v55  ;;  %v847_v12 = vmax.f32 %v553_v1, %v721_v55  ;;  %v429_v13 = vrot.slane %v331_v62, 1  ;;  %v723_v14 = vrot.slane %v625_v63, 2 }
  0xa6   :  { %v262_v15 = vld [vmem:[#allocation2 + $0x1c0] sm:$0x80]  ;;  %v269_v16 = vld [vmem:[#allocation2 + $0x1f8] sm:$0x3f]  ;;  %v1128_v17 = vsel %vm1053_vm2, %v1126_v7, %v1127_v8  ;;  %v841_v18 = vmax.f32 %v547_v2, %v722_v9  ;;  %v848_v19 = vmax.f32 %v554_v3, %v722_v9  ;;  %v430_v20 = vrot.slane %v332_v5, 1 }
  0xa7   :  { %v626_v21 = vld [vmem:[#allocation2 + $0x1f8] sm:$0xfe]  ;;  %1275 = vst [vmem:[#allocation3 + $0xf8] sm:$0x7f] %v1128_v17  ;;  %v1129_v23 = vrot.slane %v840_v11, 7  ;;  %v1130_v24 = vrot.slane %v847_v12, 7  ;;  %v548_v25 = vmax.f32 %v254_v4, %v429_v13  ;;  %v555_v26 = vmax.f32 %v261_v10, %v429_v13 }
  0xa8   :  { %v627_v27 = vld [vmem:[#allocation2 + $0x200] sm:$0xfe]  ;;  %v334_v28 = vld [vmem:[#allocation2 + $0x208] sm:$0x7f]  ;;  %v1132_v29 = vrot.slane %v841_v18, 7  ;;  %v1133_v30 = vrot.slane %v848_v19, 7  ;;  %v556_v31 = vmax.f32 %v262_v15, %v430_v20  ;;  %v563_v32 = vmax.f32 %v269_v16, %v430_v20 }
  0xa9   :  { %v263_v33 = vld [vmem:[#allocation2 + $0x1c8] sm:$0x80]  ;;  %v1131_v34 = vsel %vm1053_vm2, %v1129_v23, %v1130_v24  ;;  %v842_v35 = vmax.f32 %v548_v25, %v723_v14  ;;  %v849_v36 = vmax.f32 %v555_v26, %v723_v14  ;;  %v724_v37 = vrot.slane %v626_v21, 2  ;;  %v270_v38 = vld [vmem:[#allocation2 + $0x200] sm:$0x3f] }
  0xaa   :  { %v264_v39 = vld [vmem:[#allocation2 + $0x1d0] sm:$0x80]  ;;  %v271_v40 = vld [vmem:[#allocation2 + $0x208] sm:$0x3f]  ;;  %1276 = vst [vmem:[#allocation3 + $0x100] sm:$0x7f] %v1131_v34  ;;  %v1134_v41 = vsel %vm1053_vm2, %v1132_v29, %v1133_v30 }
  0xab   :  { %v431_v42 = vrot.slane %v333_v22, 1  ;;  %v725_v43 = vrot.slane %v627_v27, 2  ;;  %v432_v44 = vrot.slane %v334_v28, 1  ;;  %v628_v45 = vld [vmem:[#allocation2 + $0x208] sm:$0xfe]  ;;  %v1135_v46 = vrot.slane %v842_v35, 7 }
  0xac   :  { %1277 = vst [vmem:[#allocation3 + $0x108] sm:$0x7f] %v1134_v41  ;;  %v1136_v47 = vrot.slane %v849_v36, 7  ;;  %v850_v48 = vmax.f32 %v556_v31, %v724_v37  ;;  %v857_v49 = vmax.f32 %v563_v32, %v724_v37  ;;  %v335_v50 = vld [vmem:[#allocation2 + $0x210] sm:$0x7f]  ;;  %v726_v61 = vrot.slane %v628_v45, 2 }
  0xad   :  { %v629_v51 = vld [vmem:[#allocation2 + $0x210] sm:$0xfe]  ;;  %v557_v52 = vmax.f32 %v263_v33, %v431_v42  ;;  %v564_v53 = vmax.f32 %v270_v38, %v431_v42  ;;  %v558_v54 = vmax.f32 %v264_v39, %v432_v44  ;;  %v565_v55 = vmax.f32 %v271_v40, %v432_v44  ;;  %v265_v56 = vld [vmem:[#allocation2 + $0x1d8] sm:$0x80]  ;;  %v336_v57 = vld [vmem:[#allocation2 + $0x218] sm:$0x7f] }
  0xae   :  { %v1137_v58 = vsel %vm1053_vm2, %v1135_v46, %v1136_v47  ;;  %v1138_v59 = vrot.slane %v850_v48, 7  ;;  %v1139_v60 = vrot.slane %v857_v49, 7  ;;  %v272_v62 = vld [vmem:[#allocation2 + $0x210] sm:$0x3f]  ;;  %v433_v1 = vrot.slane %v335_v50, 1 }
  0xaf   :  { %1278 = vst.msk [vmem:[#allocation3 + $0x110] sm:$0x7f] %vm162_vm1, %v1137_v58  ;;  %v851_v63 = vmax.f32 %v557_v52, %v725_v43  ;;  %v858_v0 = vmax.f32 %v564_v53, %v725_v43  ;;  %v727_v2 = vrot.slane %v629_v51, 2  ;;  %v266_v3 = vld [vmem:[#allocation2 + $0x1e0] sm:$0x80]  ;;  %v852_v6 = vmax.f32 %v558_v54, %v726_v61 }
  0xb0   :  { %v273_v4 = vld [vmem:[#allocation2 + $0x218] sm:$0x3f]  ;;  %v1140_v5 = vsel %vm1053_vm2, %v1138_v59, %v1139_v60  ;;  %v859_v7 = vmax.f32 %v565_v55, %v726_v61  ;;  %v434_v8 = vrot.slane %v336_v57, 1  ;;  %v337_v10 = vld [vmem:[#allocation2 + $0x220] sm:$0x7f]  ;;  %v559_v13 = vmax.f32 %v265_v56, %v433_v1 }
  0xb1   :  { %v630_v9 = vld [vmem:[#allocation2 + $0x218] sm:$0xfe]  ;;  %1279 = vst [vmem:[#allocation3 + $0x118] sm:$0x7f] %v1140_v5  ;;  %v1141_v11 = vrot.slane %v851_v63, 7  ;;  %v1142_v12 = vrot.slane %v858_v0, 7  ;;  %v566_v14 = vmax.f32 %v272_v62, %v433_v1 }
  0xb2   :  { %v631_v15 = vld [vmem:[#allocation2 + $0x220] sm:$0xfe]  ;;  %v338_v16 = vld [vmem:[#allocation2 + $0x228] sm:$0x7f]  ;;  %v1144_v17 = vrot.slane %v852_v6, 7  ;;  %v1145_v18 = vrot.slane %v859_v7, 7  ;;  %v560_v19 = vmax.f32 %v266_v3, %v434_v8  ;;  %v567_v20 = vmax.f32 %v273_v4, %v434_v8 }
  0xb3   :  { %v267_v21 = vld [vmem:[#allocation2 + $0x1e8] sm:$0x80]  ;;  %v1143_v22 = vsel %vm1053_vm2, %v1141_v11, %v1142_v12  ;;  %v853_v23 = vmax.f32 %v559_v13, %v727_v2  ;;  %v860_v24 = vmax.f32 %v566_v14, %v727_v2  ;;  %v728_v25 = vrot.slane %v630_v9, 2  ;;  %v274_v26 = vld [vmem:[#allocation2 + $0x220] sm:$0x3f] }
  0xb4   :  { %v268_v27 = vld [vmem:[#allocation2 + $0x1f0] sm:$0x80]  ;;  %v275_v28 = vld [vmem:[#allocation2 + $0x228] sm:$0x3f]  ;;  %1280 = vst [vmem:[#allocation3 + $0x120] sm:$0x7f] %v1143_v22  ;;  %v1146_v29 = vsel %vm1053_vm2, %v1144_v17, %v1145_v18 }
  0xb5   :  { %v435_v30 = vrot.slane %v337_v10, 1  ;;  %v729_v31 = vrot.slane %v631_v15, 2  ;;  %v436_v32 = vrot.slane %v338_v16, 1  ;;  %v632_v33 = vld [vmem:[#allocation2 + $0x228] sm:$0xfe]  ;;  %v1147_v34 = vrot.slane %v853_v23, 7 }
  0xb6   :  { %1281 = vst [vmem:[#allocation3 + $0x128] sm:$0x7f] %v1146_v29  ;;  %v1148_v35 = vrot.slane %v860_v24, 7  ;;  %v854_v36 = vmax.f32 %v560_v19, %v728_v25  ;;  %v861_v37 = vmax.f32 %v567_v20, %v728_v25  ;;  %v339_v38 = vld [vmem:[#allocation2 + $0x268] sm:$0x7f]  ;;  %v730_v49 = vrot.slane %v632_v33, 2 }
  0xb7   :  { %v633_v39 = vld [vmem:[#allocation2 + $0x268] sm:$0xfe]  ;;  %v561_v40 = vmax.f32 %v267_v21, %v435_v30  ;;  %v568_v41 = vmax.f32 %v274_v26, %v435_v30  ;;  %v562_v42 = vmax.f32 %v268_v27, %v436_v32  ;;  %v569_v43 = vmax.f32 %v275_v28, %v436_v32  ;;  %v276_v44 = vld [vmem:[#allocation2 + $0x230] sm:$0x80]  ;;  %v340_v45 = vld [vmem:[#allocation2 + $0x270] sm:$0x7f] }
  0xb8   :  { %v1149_v46 = vsel %vm1053_vm2, %v1147_v34, %v1148_v35  ;;  %v1150_v47 = vrot.slane %v854_v36, 7  ;;  %v1151_v48 = vrot.slane %v861_v37, 7  ;;  %v283_v50 = vld [vmem:[#allocation2 + $0x268] sm:$0x3f]  ;;  %v437_v53 = vrot.slane %v339_v38, 1 }
  0xb9   :  { %1282 = vst [vmem:[#allocation3 + $0x130] sm:$0x7f] %v1149_v46  ;;  %v855_v51 = vmax.f32 %v561_v40, %v729_v31  ;;  %v862_v52 = vmax.f32 %v568_v41, %v729_v31  ;;  %v731_v54 = vrot.slane %v633_v39, 2  ;;  %v277_v55 = vld [vmem:[#allocation2 + $0x238] sm:$0x80]  ;;  %v856_v58 = vmax.f32 %v562_v42, %v730_v49 }
  0xba   :  { %v284_v56 = vld [vmem:[#allocation2 + $0x270] sm:$0x3f]  ;;  %v1152_v57 = vsel %vm1053_vm2, %v1150_v47, %v1151_v48  ;;  %v863_v59 = vmax.f32 %v569_v43, %v730_v49  ;;  %v438_v60 = vrot.slane %v340_v45, 1  ;;  %v341_v62 = vld [vmem:[#allocation2 + $0x278] sm:$0x7f]  ;;  %v570_v1 = vmax.f32 %v276_v44, %v437_v53 }
  0xbb   :  { %v634_v61 = vld [vmem:[#allocation2 + $0x270] sm:$0xfe]  ;;  %1283 = vst [vmem:[#allocation3 + $0x138] sm:$0x7f] %v1152_v57  ;;  %v1153_v63 = vrot.slane %v855_v51, 7  ;;  %v1154_v0 = vrot.slane %v862_v52, 7  ;;  %v577_v2 = vmax.f32 %v283_v50, %v437_v53 }
  0xbc   :  { %v635_v3 = vld [vmem:[#allocation2 + $0x278] sm:$0xfe]  ;;  %v342_v4 = vld [vmem:[#allocation2 + $0x280] sm:$0x7f]  ;;  %v1156_v5 = vrot.slane %v856_v58, 7  ;;  %v1157_v6 = vrot.slane %v863_v59, 7  ;;  %v571_v7 = vmax.f32 %v277_v55, %v438_v60  ;;  %v578_v8 = vmax.f32 %v284_v56, %v438_v60 }
  0xbd   :  { %v278_v9 = vld [vmem:[#allocation2 + $0x240] sm:$0x80]  ;;  %v1155_v10 = vsel %vm1053_vm2, %v1153_v63, %v1154_v0  ;;  %v864_v11 = vmax.f32 %v570_v1, %v731_v54  ;;  %v871_v12 = vmax.f32 %v577_v2, %v731_v54  ;;  %v732_v13 = vrot.slane %v634_v61, 2  ;;  %v285_v14 = vld [vmem:[#allocation2 + $0x278] sm:$0x3f] }
  0xbe   :  { %v279_v15 = vld [vmem:[#allocation2 + $0x248] sm:$0x80]  ;;  %v286_v16 = vld [vmem:[#allocation2 + $0x280] sm:$0x3f]  ;;  %1284 = vst [vmem:[#allocation3 + $0x140] sm:$0x7f] %v1155_v10  ;;  %v1158_v17 = vsel %vm1053_vm2, %v1156_v5, %v1157_v6 }
  0xbf   :  { %v439_v18 = vrot.slane %v341_v62, 1  ;;  %v733_v19 = vrot.slane %v635_v3, 2  ;;  %v440_v20 = vrot.slane %v342_v4, 1  ;;  %v636_v21 = vld [vmem:[#allocation2 + $0x280] sm:$0xfe]  ;;  %v1159_v22 = vrot.slane %v864_v11, 7 }
  0xc0   :  { %1285 = vst.msk [vmem:[#allocation3 + $0x148] sm:$0x7f] %vm162_vm1, %v1158_v17  ;;  %v1160_v23 = vrot.slane %v871_v12, 7  ;;  %v865_v24 = vmax.f32 %v571_v7, %v732_v13  ;;  %v872_v25 = vmax.f32 %v578_v8, %v732_v13  ;;  %v343_v26 = vld [vmem:[#allocation2 + $0x288] sm:$0x7f]  ;;  %v734_v37 = vrot.slane %v636_v21, 2 }
  0xc1   :  { %v637_v27 = vld [vmem:[#allocation2 + $0x288] sm:$0xfe]  ;;  %v572_v28 = vmax.f32 %v278_v9, %v439_v18  ;;  %v579_v29 = vmax.f32 %v285_v14, %v439_v18  ;;  %v573_v30 = vmax.f32 %v279_v15, %v440_v20  ;;  %v580_v31 = vmax.f32 %v286_v16, %v440_v20  ;;  %v280_v32 = vld [vmem:[#allocation2 + $0x250] sm:$0x80]  ;;  %v344_v33 = vld [vmem:[#allocation2 + $0x290] sm:$0x7f] }
  0xc2   :  { %v1161_v34 = vsel %vm1053_vm2, %v1159_v22, %v1160_v23  ;;  %v1162_v35 = vrot.slane %v865_v24, 7  ;;  %v1163_v36 = vrot.slane %v872_v25, 7  ;;  %v287_v38 = vld [vmem:[#allocation2 + $0x288] sm:$0x3f]  ;;  %v441_v41 = vrot.slane %v343_v26, 1 }
  0xc3   :  { %1286 = vst [vmem:[#allocation3 + $0x150] sm:$0x7f] %v1161_v34  ;;  %v866_v39 = vmax.f32 %v572_v28, %v733_v19  ;;  %v873_v40 = vmax.f32 %v579_v29, %v733_v19  ;;  %v735_v42 = vrot.slane %v637_v27, 2  ;;  %v281_v43 = vld [vmem:[#allocation2 + $0x258] sm:$0x80]  ;;  %v867_v46 = vmax.f32 %v573_v30, %v734_v37 }
  0xc4   :  { %v288_v44 = vld [vmem:[#allocation2 + $0x290] sm:$0x3f]  ;;  %v1164_v45 = vsel %vm1053_vm2, %v1162_v35, %v1163_v36  ;;  %v874_v47 = vmax.f32 %v580_v31, %v734_v37  ;;  %v442_v48 = vrot.slane %v344_v33, 1  ;;  %v345_v50 = vld [vmem:[#allocation2 + $0x298] sm:$0x7f]  ;;  %v574_v53 = vmax.f32 %v280_v32, %v441_v41 }
  0xc5   :  { %v638_v49 = vld [vmem:[#allocation2 + $0x290] sm:$0xfe]  ;;  %1287 = vst [vmem:[#allocation3 + $0x158] sm:$0x7f] %v1164_v45  ;;  %v1165_v51 = vrot.slane %v866_v39, 7  ;;  %v1166_v52 = vrot.slane %v873_v40, 7  ;;  %v581_v54 = vmax.f32 %v287_v38, %v441_v41 }
  0xc6   :  { %v639_v55 = vld [vmem:[#allocation2 + $0x298] sm:$0xfe]  ;;  %v1168_v57 = vrot.slane %v867_v46, 7  ;;  %v1169_v58 = vrot.slane %v874_v47, 7  ;;  %v575_v59 = vmax.f32 %v281_v43, %v442_v48  ;;  %v582_v60 = vmax.f32 %v288_v44, %v442_v48  ;;  %v282_v61 = vld [vmem:[#allocation2 + $0x260] sm:$0x80] }
  0xc7   :  { %v346_v56 = vld [vmem:[#allocation2 + $0x2d8] sm:$0x7f]  ;;  %v1167_v62 = vsel %vm1053_vm2, %v1165_v51, %v1166_v52  ;;  %v868_v63 = vmax.f32 %v574_v53, %v735_v42  ;;  %v875_v0 = vmax.f32 %v581_v54, %v735_v42  ;;  %v736_v1 = vrot.slane %v638_v49, 2  ;;  %v290_v3 = vld [vmem:[#allocation2 + $0x2a0] sm:$0x80] }
  0xc8   :  { %v289_v2 = vld [vmem:[#allocation2 + $0x298] sm:$0x3f]  ;;  %1288 = vst [vmem:[#allocation3 + $0x160] sm:$0x7f] %v1167_v62  ;;  %v1170_v5 = vsel %vm1053_vm2, %v1168_v57, %v1169_v58  ;;  %v443_v6 = vrot.slane %v345_v50, 1  ;;  %v737_v7 = vrot.slane %v639_v55, 2 }
  0xc9   :  { %v297_v4 = vld [vmem:[#allocation2 + $0x2d8] sm:$0x3f]  ;;  %v444_v8 = vrot.slane %v346_v56, 1  ;;  %1289 = vst [vmem:[#allocation3 + $0x168] sm:$0x7f] %v1170_v5  ;;  %v1171_v10 = vrot.slane %v868_v63, 7  ;;  %v869_v12 = vmax.f32 %v575_v59, %v736_v1  ;;  %v876_v13 = vmax.f32 %v582_v60, %v736_v1 }
  0xca   :  { %v640_v9 = vld [vmem:[#allocation2 + $0x2d8] sm:$0xfe]  ;;  %v1172_v11 = vrot.slane %v875_v0, 7  ;;  %v347_v14 = vld [vmem:[#allocation2 + $0x2e0] sm:$0x7f]  ;;  %v576_v16 = vmax.f32 %v282_v61, %v443_v6  ;;  %v583_v17 = vmax.f32 %v289_v2, %v443_v6 }
  0xcb   :  { %v641_v15 = vld [vmem:[#allocation2 + $0x2e0] sm:$0xfe]  ;;  %v584_v18 = vmax.f32 %v290_v3, %v444_v8  ;;  %v591_v19 = vmax.f32 %v297_v4, %v444_v8  ;;  %v291_v20 = vld [vmem:[#allocation2 + $0x2a8] sm:$0x80]  ;;  %v348_v21 = vld [vmem:[#allocation2 + $0x2e8] sm:$0x7f] }
  0xcc   :  { %v1173_v22 = vsel %vm1053_vm2, %v1171_v10, %v1172_v11  ;;  %v1174_v23 = vrot.slane %v869_v12, 7  ;;  %v1175_v24 = vrot.slane %v876_v13, 7  ;;  %v738_v25 = vrot.slane %v640_v9, 2  ;;  %v298_v26 = vld [vmem:[#allocation2 + $0x2e0] sm:$0x3f] }
  0xcd   :  { %1290 = vst [vmem:[#allocation3 + $0x170] sm:$0x7f] %v1173_v22  ;;  %v870_v27 = vmax.f32 %v576_v16, %v737_v7  ;;  %v877_v28 = vmax.f32 %v583_v17, %v737_v7  ;;  %v445_v29 = vrot.slane %v347_v14, 1  ;;  %v739_v30 = vrot.slane %v641_v15, 2  ;;  %v292_v31 = vld [vmem:[#allocation2 + $0x2b0] sm:$0x80] }
  0xce   :  { %v299_v32 = vld [vmem:[#allocation2 + $0x2e8] sm:$0x3f]  ;;  %v1176_v33 = vsel %vm1053_vm2, %v1174_v23, %v1175_v24  ;;  %v878_v34 = vmax.f32 %v584_v18, %v738_v25  ;;  %v885_v35 = vmax.f32 %v591_v19, %v738_v25  ;;  %v446_v36 = vrot.slane %v348_v21, 1  ;;  %v349_v38 = vld [vmem:[#allocation2 + $0x2f0] sm:$0x7f] }
  0xcf   :  { %v642_v37 = vld [vmem:[#allocation2 + $0x2e8] sm:$0xfe]  ;;  %1291 = vst [vmem:[#allocation3 + $0x178] sm:$0x7f] %v1176_v33  ;;  %v1177_v39 = vrot.slane %v870_v27, 7  ;;  %v1178_v40 = vrot.slane %v877_v28, 7  ;;  %v585_v41 = vmax.f32 %v291_v20, %v445_v29  ;;  %v592_v42 = vmax.f32 %v298_v26, %v445_v29 }
  0xd0   :  { %v643_v43 = vld [vmem:[#allocation2 + $0x2f0] sm:$0xfe]  ;;  %v350_v44 = vld [vmem:[#allocation2 + $0x2f8] sm:$0x7f]  ;;  %v1180_v45 = vrot.slane %v878_v34, 7  ;;  %v1181_v46 = vrot.slane %v885_v35, 7  ;;  %v586_v47 = vmax.f32 %v292_v31, %v446_v36  ;;  %v593_v48 = vmax.f32 %v299_v32, %v446_v36 }
  0xd1   :  { %v293_v49 = vld [vmem:[#allocation2 + $0x2b8] sm:$0x80]  ;;  %v1179_v50 = vsel %vm1053_vm2, %v1177_v39, %v1178_v40  ;;  %v879_v51 = vmax.f32 %v585_v41, %v739_v30  ;;  %v886_v52 = vmax.f32 %v592_v42, %v739_v30  ;;  %v740_v53 = vrot.slane %v642_v37, 2  ;;  %v300_v54 = vld [vmem:[#allocation2 + $0x2f0] sm:$0x3f] }
  0xd2   :  { %v294_v55 = vld [vmem:[#allocation2 + $0x2c0] sm:$0x80]  ;;  %v301_v56 = vld [vmem:[#allocation2 + $0x2f8] sm:$0x3f]  ;;  %1292 = vst.msk [vmem:[#allocation3 + $0x180] sm:$0x7f] %vm162_vm1, %v1179_v50  ;;  %v1182_v57 = vsel %vm1053_vm2, %v1180_v45, %v1181_v46 }
  0xd3   :  { %v447_v58 = vrot.slane %v349_v38, 1  ;;  %v741_v59 = vrot.slane %v643_v43, 2  ;;  %v448_v60 = vrot.slane %v350_v44, 1  ;;  %v644_v61 = vld [vmem:[#allocation2 + $0x2f8] sm:$0xfe]  ;;  %v1183_v62 = vrot.slane %v879_v51, 7 }
  0xd4   :  { %1293 = vst [vmem:[#allocation3 + $0x188] sm:$0x7f] %v1182_v57  ;;  %v1184_v63 = vrot.slane %v886_v52, 7  ;;  %v880_v0 = vmax.f32 %v586_v47, %v740_v53  ;;  %v887_v1 = vmax.f32 %v593_v48, %v740_v53  ;;  %v351_v2 = vld [vmem:[#allocation2 + $0x300] sm:$0x7f]  ;;  %v742_v14 = vrot.slane %v644_v61, 2 }
  0xd5   :  { %v645_v3 = vld [vmem:[#allocation2 + $0x300] sm:$0xfe]  ;;  %v587_v4 = vmax.f32 %v293_v49, %v447_v58  ;;  %v594_v5 = vmax.f32 %v300_v54, %v447_v58  ;;  %v588_v6 = vmax.f32 %v294_v55, %v448_v60  ;;  %v595_v7 = vmax.f32 %v301_v56, %v448_v60  ;;  %v295_v8 = vld [vmem:[#allocation2 + $0x2c8] sm:$0x80]  ;;  %v296_v9 = vld [vmem:[#allocation2 + $0x2d0] sm:$0x80] }
  0xd6   :  { %v352_v10 = vld [vmem:[#allocation2 + $0x308] sm:$0x7f]  ;;  %v1185_v11 = vsel %vm1053_vm2, %v1183_v62, %v1184_v63  ;;  %v1186_v12 = vrot.slane %v880_v0, 7  ;;  %v1187_v13 = vrot.slane %v887_v1, 7  ;;  %v302_v15 = vld [vmem:[#allocation2 + $0x300] sm:$0x3f] }
  0xd7   :  { %v646_v16 = vld [vmem:[#allocation2 + $0x308] sm:$0xfe]  ;;  %1294 = vst [vmem:[#allocation3 + $0x190] sm:$0x7f] %v1185_v11  ;;  %v881_v17 = vmax.f32 %v587_v4, %v741_v59  ;;  %v888_v18 = vmax.f32 %v594_v5, %v741_v59  ;;  %v449_v19 = vrot.slane %v351_v2, 1  ;;  %v743_v20 = vrot.slane %v645_v3, 2 }
  0xd8   :  { %v303_v21 = vld [vmem:[#allocation2 + $0x308] sm:$0x3f]  ;;  %v1300_v22 = vld [vmem:[#allocation3] sm:$0x7f]  ;;  %v1301_v24 = vld [vmem:[#allocation3 + $0x8] sm:$0x7f]  ;;  %v1188_v25 = vsel %vm1053_vm2, %v1186_v12, %v1187_v13  ;;  %v882_v26 = vmax.f32 %v588_v6, %v742_v14  ;;  %v889_v27 = vmax.f32 %v595_v7, %v742_v14 }
  0xd9   :  { %v1349_v23 = vld [vmem:[#allocation3 + $0x38] sm:$0x7f]  ;;  %v450_v28 = vrot.slane %v352_v10, 1  ;;  %v1350_v29 = vld [vmem:[#allocation3 + $0x40] sm:$0x7f]  ;;  %v1189_v31 = vrot.slane %v881_v17, 7  ;;  %v589_v33 = vmax.f32 %v295_v8, %v449_v19  ;;  %v596_v34 = vmax.f32 %v302_v15, %v449_v19 }
  0xda   :  { %v1302_v30 = vld [vmem:[#allocation3 + $0x10] sm:$0x7f]  ;;  %1295 = vst [vmem:[#allocation3 + $0x198] sm:$0x7f] %v1188_v25  ;;  %v1190_v32 = vrot.slane %v888_v18, 7  ;;  %v1192_v37 = vrot.slane %v882_v26, 7  ;;  %v1398_v53 = vmax.f32 %v1300_v22, %v1349_v23  ;;  %v1399_v54 = vmax.f32 %v1301_v24, %v1350_v29 }
  0xdb   :  { %v1351_v35 = vld [vmem:[#allocation3 + $0x48] sm:$0x7f]  ;;  %v1303_v36 = vld [vmem:[#allocation3 + $0x18] sm:$0x7f]  ;;  %v1193_v38 = vrot.slane %v889_v27, 7  ;;  %v590_v39 = vmax.f32 %v296_v9, %v450_v28  ;;  %v597_v40 = vmax.f32 %v303_v21, %v450_v28  ;;  %v883_v44 = vmax.f32 %v589_v33, %v743_v20 }
  0xdc   :  { %v1352_v41 = vld [vmem:[#allocation3 + $0x50] sm:$0x7f]  ;;  %v1304_v42 = vld [vmem:[#allocation3 + $0x20] sm:$0x7f]  ;;  %v1191_v43 = vsel %vm1053_vm2, %v1189_v31, %v1190_v32  ;;  %v890_v45 = vmax.f32 %v596_v34, %v743_v20  ;;  %v744_v46 = vrot.slane %v646_v16, 2  ;;  %v1400_v55 = vmax.f32 %v1302_v30, %v1351_v35 }
  0xdd   :  { %v1448_v47 = vld [vmem:[#allocation3 + $0x70] sm:$0x7f]  ;;  %v1449_v48 = vld [vmem:[#allocation3 + $0x78] sm:$0x7f]  ;;  %v1450_v49 = vld [vmem:[#allocation3 + $0x80] sm:$0x7f]  ;;  %v1194_v52 = vsel %vm1053_vm2, %v1192_v37, %v1193_v38  ;;  %v1401_v5 = vmax.f32 %v1303_v36, %v1352_v41 }
  0xde   :  { %v1353_v50 = vld [vmem:[#allocation3 + $0x58] sm:$0x7f]  ;;  %v1305_v51 = vld [vmem:[#allocation3 + $0x28] sm:$0x7f]  ;;  %1296 = vst [vmem:[#allocation3 + $0x1a0] sm:$0x7f] %v1191_v43  ;;  %v884_v61 = vmax.f32 %v590_v39, %v744_v46  ;;  %v891_v62 = vmax.f32 %v597_v40, %v744_v46  ;;  %v1497_v2 = vmax.f32 %v1398_v53, %v1448_v47  ;;  %v1498_v3 = vmax.f32 %v1399_v54, %v1449_v48 }
  0xdf   :  { %v1354_v56 = vld [vmem:[#allocation3 + $0x60] sm:$0x7f]  ;;  %v1306_v57 = vld [vmem:[#allocation3 + $0x30] sm:$0x7f]  ;;  %v1355_v58 = vld [vmem:[#allocation3 + $0x68] sm:$0x7f]  ;;  %v1499_v4 = vmax.f32 %v1400_v55, %v1450_v49  ;;  %v1402_v12 = vmax.f32 %v1304_v42, %v1353_v50 }
  0xe0   :  { %1297 = vst [vmem:[#allocation3 + $0x1a8] sm:$0x7f] %v1194_v52  ;;  %v1195_v59 = vrot.slane %v883_v44, 7  ;;  %v1196_v60 = vrot.slane %v890_v45, 7  ;;  %v1451_v63 = vld [vmem:[#allocation3 + $0x88] sm:$0x7f]  ;;  %v1403_v18 = vmax.f32 %v1305_v51, %v1354_v56  ;;  %v1404_v19 = vmax.f32 %v1306_v57, %v1355_v58 }
  0xe1   :  { %v1307_v0 = vld [vmem:[#allocation3 + $0x38] sm:$0x7f]  ;;  %v1356_v1 = vld [vmem:[#allocation3 + $0x70] sm:$0x7f]  ;;  %v1308_v7 = vld [vmem:[#allocation3 + $0x40] sm:$0x7f]  ;;  %v1500_v17 = vmax.f32 %v1401_v5, %v1451_v63 }
  0xe2   :  { %v1452_v6 = vld [vmem:[#allocation3 + $0x90] sm:$0x7f]  ;;  %v1357_v8 = vld [vmem:[#allocation3 + $0x78] sm:$0x7f]  ;;  %v1197_v9 = vsel %vm1053_vm2, %v1195_v59, %v1196_v60  ;;  %v1198_v10 = vrot.slane %v884_v61, 7  ;;  %v1199_v11 = vrot.slane %v891_v62, 7  ;;  %v1405_v20 = vmax.f32 %v1307_v0, %v1356_v1 }
  0xe3   :  { %v1453_v13 = vld [vmem:[#allocation3 + $0x98] sm:$0x7f]  ;;  %v1454_v14 = vld [vmem:[#allocation3 + $0xa0] sm:$0x7f]  ;;  %v1455_v15 = vld [vmem:[#allocation3 + $0xa8] sm:$0x7f]  ;;  %v1501_v26 = vmax.f32 %v1402_v12, %v1452_v6  ;;  %v1406_v27 = vmax.f32 %v1308_v7, %v1357_v8 }
  0xe4   :  { %v1309_v16 = vld [vmem:[#allocation3 + $0x48] sm:$0x7f]  ;;  %1298 = vst [vmem:[#allocation3 + $0x1b0] sm:$0x7f] %v1197_v9  ;;  %1546 = vst [vmem:[%s2160_s1] sm:$0x7f] %v1497_v2  ;;  %v1200_v25 = vsel %vm1053_vm2, %v1198_v10, %v1199_v11  ;;  %v1502_v32 = vmax.f32 %v1403_v18, %v1453_v13  ;;  %v1503_v33 = vmax.f32 %v1404_v19, %v1454_v14 }
  0xe5   :  { %1547 = vst [vmem:[%s2160_s1 + $0x8] sm:$0x7f] %v1498_v3  ;;  %1548 = vst [vmem:[%s2160_s1 + $0x10] sm:$0x7f] %v1499_v4  ;;  %v1456_v21 = vld [vmem:[#allocation3 + $0xb0] sm:$0x7f]  ;;  %v1504_v34 = vmax.f32 %v1405_v20, %v1455_v15 }
  0xe6   :  { %v1358_v22 = vld [vmem:[#allocation3 + $0x80] sm:$0x7f]  ;;  %v1457_v23 = vld [vmem:[#allocation3 + $0xb8] sm:$0x7f]  ;;  %v1310_v24 = vld [vmem:[#allocation3 + $0x50] sm:$0x7f]  ;;  %v1505_v39 = vmax.f32 %v1406_v27, %v1456_v21 }
  0xe7   :  { %v1407_v28 = vmax.f32 %v1309_v16, %v1358_v22  ;;  %v1359_v29 = vld [vmem:[#allocation3 + $0x88] sm:$0x7f]  ;;  %v1458_v30 = vld [vmem:[#allocation3 + $0xc0] sm:$0x7f]  ;;  %v1311_v31 = vld [vmem:[#allocation3 + $0x58] sm:$0x7f] }
  0xe8   :  { %1299 = vst.msk [vmem:[#allocation3 + $0x1b8] sm:$0x7f] %vm162_vm1, %v1200_v25  ;;  %1549 = vst [vmem:[%s2160_s1 + $0x18] sm:$0x7f] %v1500_v17  ;;  %v1408_v35 = vmax.f32 %v1310_v24, %v1359_v29  ;;  %v1360_v36 = vld [vmem:[#allocation3 + $0x90] sm:$0x7f] }
  0xe9   :  { %v1459_v37 = vld [vmem:[#allocation3 + $0xc8] sm:$0x7f]  ;;  %v1312_v38 = vld [vmem:[#allocation3 + $0x60] sm:$0x7f]  ;;  %1550 = vst [vmem:[%s2160_s1 + $0x20] sm:$0x7f] %v1501_v26  ;;  %v1506_v40 = vmax.f32 %v1407_v28, %v1457_v23  ;;  %v1409_v41 = vmax.f32 %v1311_v31, %v1360_v36 }
  0xea   :  { %v1361_v42 = vld [vmem:[#allocation3 + $0x98] sm:$0x7f]  ;;  %v1460_v43 = vld [vmem:[#allocation3 + $0xd0] sm:$0x7f]  ;;  %v1313_v44 = vld [vmem:[#allocation3 + $0x68] sm:$0x7f]  ;;  %v1507_v45 = vmax.f32 %v1408_v35, %v1458_v30 }
  0xeb   :  { %1551 = vst [vmem:[%s2160_s1 + $0x28] sm:$0x7f] %v1502_v32  ;;  %1552 = vst.msk [vmem:[%s2160_s1 + $0x30] sm:$0x7f] %vm162_vm1, %v1503_v33  ;;  %v1410_v46 = vmax.f32 %v1312_v38, %v1361_v42  ;;  %v1362_v47 = vld [vmem:[#allocation3 + $0xa0] sm:$0x7f]  ;;  %v1508_v50 = vmax.f32 %v1409_v41, %v1459_v37 }
  0xec   :  { %1553 = vst [vmem:[%s2160_s1 + $0x38] sm:$0x7f] %v1504_v34  ;;  %v1461_v48 = vld [vmem:[#allocation3 + $0xd8] sm:$0x7f]  ;;  %v1314_v49 = vld [vmem:[#allocation3 + $0x70] sm:$0x7f]  ;;  %v1411_v51 = vmax.f32 %v1313_v44, %v1362_v47 }
  0xed   :  { %1554 = vst [vmem:[%s2160_s1 + $0x40] sm:$0x7f] %v1505_v39  ;;  %1555 = vst [vmem:[%s2160_s1 + $0x48] sm:$0x7f] %v1506_v40  ;;  %v1363_v52 = vld [vmem:[#allocation3 + $0xa8] sm:$0x7f]  ;;  %v1509_v55 = vmax.f32 %v1410_v46, %v1460_v43 }
  0xee   :  { %v1462_v53 = vld [vmem:[#allocation3 + $0xe0] sm:$0x7f]  ;;  %v1315_v54 = vld [vmem:[#allocation3 + $0x78] sm:$0x7f]  ;;  %1556 = vst [vmem:[%s2160_s1 + $0x50] sm:$0x7f] %v1507_v45  ;;  %v1412_v56 = vmax.f32 %v1314_v49, %v1363_v52  ;;  %v1510_v60 = vmax.f32 %v1411_v51, %v1461_v48 }
  0xef   :  { %v1364_v57 = vld [vmem:[#allocation3 + $0xb0] sm:$0x7f]  ;;  %v1463_v58 = vld [vmem:[#allocation3 + $0xe8] sm:$0x7f]  ;;  %v1316_v59 = vld [vmem:[#allocation3 + $0x80] sm:$0x7f] }
  0xf0   :  { %1557 = vst [vmem:[%s2160_s1 + $0x58] sm:$0x7f] %v1508_v50  ;;  %v1413_v61 = vmax.f32 %v1315_v54, %v1364_v57  ;;  %v1365_v62 = vld [vmem:[#allocation3 + $0xb8] sm:$0x7f]  ;;  %v1464_v63 = vld [vmem:[#allocation3 + $0xf0] sm:$0x7f]  ;;  %v1511_v1 = vmax.f32 %v1412_v56, %v1462_v53 }
  0xf1   :  { %v1317_v0 = vld [vmem:[#allocation3 + $0x88] sm:$0x7f]  ;;  %1558 = vst [vmem:[%s2160_s1 + $0x60] sm:$0x7f] %v1509_v55  ;;  %v1414_v2 = vmax.f32 %v1316_v59, %v1365_v62  ;;  %v1366_v3 = vld [vmem:[#allocation3 + $0xc0] sm:$0x7f] }
  0xf2   :  { %v1465_v4 = vld [vmem:[#allocation3 + $0xf8] sm:$0x7f]  ;;  %v1318_v5 = vld [vmem:[#allocation3 + $0x90] sm:$0x7f]  ;;  %1559 = vst.msk [vmem:[%s2160_s1 + $0x68] sm:$0x7f] %vm162_vm1, %v1510_v60  ;;  %v1512_v6 = vmax.f32 %v1413_v61, %v1463_v58  ;;  %v1415_v7 = vmax.f32 %v1317_v0, %v1366_v3 }
  0xf3   :  { %v1367_v8 = vld [vmem:[#allocation3 + $0xc8] sm:$0x7f]  ;;  %v1466_v9 = vld [vmem:[#allocation3 + $0x100] sm:$0x7f]  ;;  %v1319_v10 = vld [vmem:[#allocation3 + $0x98] sm:$0x7f]  ;;  %v1513_v11 = vmax.f32 %v1414_v2, %v1464_v63 }
  0xf4   :  { %1560 = vst [vmem:[%s2160_s1 + $0x70] sm:$0x7f] %v1511_v1  ;;  %v1416_v12 = vmax.f32 %v1318_v5, %v1367_v8  ;;  %v1368_v13 = vld [vmem:[#allocation3 + $0xd0] sm:$0x7f]  ;;  %v1467_v14 = vld [vmem:[#allocation3 + $0x108] sm:$0x7f]  ;;  %v1514_v16 = vmax.f32 %v1415_v7, %v1465_v4 }
  0xf5   :  { %v1320_v15 = vld [vmem:[#allocation3 + $0xa0] sm:$0x7f]  ;;  %1561 = vst [vmem:[%s2160_s1 + $0x78] sm:$0x7f] %v1512_v6  ;;  %v1417_v17 = vmax.f32 %v1319_v10, %v1368_v13  ;;  %v1369_v18 = vld [vmem:[#allocation3 + $0xd8] sm:$0x7f] }
  0xf6   :  { %v1468_v19 = vld [vmem:[#allocation3 + $0x110] sm:$0x7f]  ;;  %v1321_v20 = vld [vmem:[#allocation3 + $0xa8] sm:$0x7f]  ;;  %1562 = vst [vmem:[%s2160_s1 + $0x80] sm:$0x7f] %v1513_v11  ;;  %v1515_v21 = vmax.f32 %v1416_v12, %v1466_v9  ;;  %v1418_v22 = vmax.f32 %v1320_v15, %v1369_v18 }
  0xf7   :  { %v1370_v23 = vld [vmem:[#allocation3 + $0xe0] sm:$0x7f]  ;;  %v1469_v24 = vld [vmem:[#allocation3 + $0x118] sm:$0x7f]  ;;  %v1322_v25 = vld [vmem:[#allocation3 + $0xb0] sm:$0x7f]  ;;  %v1516_v26 = vmax.f32 %v1417_v17, %v1467_v14 }
  0xf8   :  { %1563 = vst [vmem:[%s2160_s1 + $0x88] sm:$0x7f] %v1514_v16  ;;  %v1419_v27 = vmax.f32 %v1321_v20, %v1370_v23  ;;  %v1371_v28 = vld [vmem:[#allocation3 + $0xe8] sm:$0x7f]  ;;  %v1470_v29 = vld [vmem:[#allocation3 + $0x120] sm:$0x7f]  ;;  %v1517_v31 = vmax.f32 %v1418_v22, %v1468_v19 }
  0xf9   :  { %v1323_v30 = vld [vmem:[#allocation3 + $0xb8] sm:$0x7f]  ;;  %1564 = vst [vmem:[%s2160_s1 + $0x90] sm:$0x7f] %v1515_v21  ;;  %v1420_v32 = vmax.f32 %v1322_v25, %v1371_v28  ;;  %v1372_v33 = vld [vmem:[#allocation3 + $0xf0] sm:$0x7f] }
  0xfa   :  { %v1471_v34 = vld [vmem:[#allocation3 + $0x128] sm:$0x7f]  ;;  %v1324_v35 = vld [vmem:[#allocation3 + $0xc0] sm:$0x7f]  ;;  %1565 = vst [vmem:[%s2160_s1 + $0x98] sm:$0x7f] %v1516_v26  ;;  %v1518_v36 = vmax.f32 %v1419_v27, %v1469_v24  ;;  %v1421_v37 = vmax.f32 %v1323_v30, %v1372_v33 }
  0xfb   :  { %v1373_v38 = vld [vmem:[#allocation3 + $0xf8] sm:$0x7f]  ;;  %v1472_v39 = vld [vmem:[#allocation3 + $0x130] sm:$0x7f]  ;;  %v1325_v40 = vld [vmem:[#allocation3 + $0xc8] sm:$0x7f]  ;;  %v1519_v41 = vmax.f32 %v1420_v32, %v1470_v29 }
  0xfc   :  { %1566 = vst.msk [vmem:[%s2160_s1 + $0xa0] sm:$0x7f] %vm162_vm1, %v1517_v31  ;;  %v1422_v42 = vmax.f32 %v1324_v35, %v1373_v38  ;;  %v1374_v43 = vld [vmem:[#allocation3 + $0x100] sm:$0x7f]  ;;  %v1473_v44 = vld [vmem:[#allocation3 + $0x138] sm:$0x7f]  ;;  %v1520_v46 = vmax.f32 %v1421_v37, %v1471_v34 }
  0xfd   :  { %v1326_v45 = vld [vmem:[#allocation3 + $0xd0] sm:$0x7f]  ;;  %1567 = vst [vmem:[%s2160_s1 + $0xa8] sm:$0x7f] %v1518_v36  ;;  %v1423_v47 = vmax.f32 %v1325_v40, %v1374_v43  ;;  %v1375_v48 = vld [vmem:[#allocation3 + $0x108] sm:$0x7f] }
  0xfe   :  { %v1474_v49 = vld [vmem:[#allocation3 + $0x140] sm:$0x7f]  ;;  %v1327_v50 = vld [vmem:[#allocation3 + $0xd8] sm:$0x7f]  ;;  %1568 = vst [vmem:[%s2160_s1 + $0xb0] sm:$0x7f] %v1519_v41  ;;  %v1521_v51 = vmax.f32 %v1422_v42, %v1472_v39  ;;  %v1424_v52 = vmax.f32 %v1326_v45, %v1375_v48 }
  0xff   :  { %v1376_v53 = vld [vmem:[#allocation3 + $0x110] sm:$0x7f]  ;;  %v1475_v54 = vld [vmem:[#allocation3 + $0x148] sm:$0x7f]  ;;  %v1328_v55 = vld [vmem:[#allocation3 + $0xe0] sm:$0x7f]  ;;  %v1522_v56 = vmax.f32 %v1423_v47, %v1473_v44 }
 0x100   :  { %1569 = vst [vmem:[%s2160_s1 + $0xb8] sm:$0x7f] %v1520_v46  ;;  %v1425_v57 = vmax.f32 %v1327_v50, %v1376_v53  ;;  %v1377_v58 = vld [vmem:[#allocation3 + $0x118] sm:$0x7f]  ;;  %v1476_v59 = vld [vmem:[#allocation3 + $0x150] sm:$0x7f]  ;;  %v1523_v61 = vmax.f32 %v1424_v52, %v1474_v49 }
 0x101   :  { %v1329_v60 = vld [vmem:[#allocation3 + $0xe8] sm:$0x7f]  ;;  %1570 = vst [vmem:[%s2160_s1 + $0xc0] sm:$0x7f] %v1521_v51  ;;  %v1426_v62 = vmax.f32 %v1328_v55, %v1377_v58  ;;  %v1378_v63 = vld [vmem:[#allocation3 + $0x120] sm:$0x7f] }
 0x102   :  { %v1477_v0 = vld [vmem:[#allocation3 + $0x158] sm:$0x7f]  ;;  %v1330_v1 = vld [vmem:[#allocation3 + $0xf0] sm:$0x7f]  ;;  %1571 = vst [vmem:[%s2160_s1 + $0xc8] sm:$0x7f] %v1522_v56  ;;  %v1524_v2 = vmax.f32 %v1425_v57, %v1475_v54  ;;  %v1427_v3 = vmax.f32 %v1329_v60, %v1378_v63 }
 0x103   :  { %v1379_v4 = vld [vmem:[#allocation3 + $0x128] sm:$0x7f]  ;;  %v1478_v5 = vld [vmem:[#allocation3 + $0x160] sm:$0x7f]  ;;  %v1331_v6 = vld [vmem:[#allocation3 + $0xf8] sm:$0x7f]  ;;  %v1525_v7 = vmax.f32 %v1426_v62, %v1476_v59 }
 0x104   :  { %1572 = vst [vmem:[%s2160_s1 + $0xd0] sm:$0x7f] %v1523_v61  ;;  %v1428_v8 = vmax.f32 %v1330_v1, %v1379_v4  ;;  %v1380_v9 = vld [vmem:[#allocation3 + $0x130] sm:$0x7f]  ;;  %v1479_v10 = vld [vmem:[#allocation3 + $0x168] sm:$0x7f]  ;;  %v1526_v12 = vmax.f32 %v1427_v3, %v1477_v0 }
 0x105   :  { %v1332_v11 = vld [vmem:[#allocation3 + $0x100] sm:$0x7f]  ;;  %1573 = vst.msk [vmem:[%s2160_s1 + $0xd8] sm:$0x7f] %vm162_vm1, %v1524_v2  ;;  %v1429_v13 = vmax.f32 %v1331_v6, %v1380_v9  ;;  %v1381_v14 = vld [vmem:[#allocation3 + $0x138] sm:$0x7f] }
 0x106   :  { %v1480_v15 = vld [vmem:[#allocation3 + $0x170] sm:$0x7f]  ;;  %v1333_v16 = vld [vmem:[#allocation3 + $0x108] sm:$0x7f]  ;;  %1574 = vst [vmem:[%s2160_s1 + $0xe0] sm:$0x7f] %v1525_v7  ;;  %v1527_v17 = vmax.f32 %v1428_v8, %v1478_v5  ;;  %v1430_v18 = vmax.f32 %v1332_v11, %v1381_v14 }
 0x107   :  { %v1382_v19 = vld [vmem:[#allocation3 + $0x140] sm:$0x7f]  ;;  %v1481_v20 = vld [vmem:[#allocation3 + $0x178] sm:$0x7f]  ;;  %v1334_v21 = vld [vmem:[#allocation3 + $0x110] sm:$0x7f]  ;;  %v1528_v22 = vmax.f32 %v1429_v13, %v1479_v10 }
 0x108   :  { %1575 = vst [vmem:[%s2160_s1 + $0xe8] sm:$0x7f] %v1526_v12  ;;  %v1431_v23 = vmax.f32 %v1333_v16, %v1382_v19  ;;  %v1383_v24 = vld [vmem:[#allocation3 + $0x148] sm:$0x7f]  ;;  %v1482_v25 = vld [vmem:[#allocation3 + $0x180] sm:$0x7f]  ;;  %v1529_v27 = vmax.f32 %v1430_v18, %v1480_v15 }
 0x109   :  { %v1335_v26 = vld [vmem:[#allocation3 + $0x118] sm:$0x7f]  ;;  %1576 = vst [vmem:[%s2160_s1 + $0xf0] sm:$0x7f] %v1527_v17  ;;  %v1432_v28 = vmax.f32 %v1334_v21, %v1383_v24  ;;  %v1384_v29 = vld [vmem:[#allocation3 + $0x150] sm:$0x7f] }
 0x10a   :  { %v1483_v30 = vld [vmem:[#allocation3 + $0x188] sm:$0x7f]  ;;  %v1336_v31 = vld [vmem:[#allocation3 + $0x120] sm:$0x7f]  ;;  %1577 = vst [vmem:[%s2160_s1 + $0xf8] sm:$0x7f] %v1528_v22  ;;  %v1530_v32 = vmax.f32 %v1431_v23, %v1481_v20  ;;  %v1433_v33 = vmax.f32 %v1335_v26, %v1384_v29 }
 0x10b   :  { %v1385_v34 = vld [vmem:[#allocation3 + $0x158] sm:$0x7f]  ;;  %v1484_v35 = vld [vmem:[#allocation3 + $0x190] sm:$0x7f]  ;;  %v1337_v36 = vld [vmem:[#allocation3 + $0x128] sm:$0x7f]  ;;  %v1531_v37 = vmax.f32 %v1432_v28, %v1482_v25 }
 0x10c   :  { %1578 = vst [vmem:[%s2160_s1 + $0x100] sm:$0x7f] %v1529_v27  ;;  %v1434_v38 = vmax.f32 %v1336_v31, %v1385_v34  ;;  %v1386_v39 = vld [vmem:[#allocation3 + $0x160] sm:$0x7f]  ;;  %v1485_v40 = vld [vmem:[#allocation3 + $0x198] sm:$0x7f]  ;;  %v1532_v42 = vmax.f32 %v1433_v33, %v1483_v30 }
 0x10d   :  { %v1338_v41 = vld [vmem:[#allocation3 + $0x130] sm:$0x7f]  ;;  %1579 = vst [vmem:[%s2160_s1 + $0x108] sm:$0x7f] %v1530_v32  ;;  %v1435_v43 = vmax.f32 %v1337_v36, %v1386_v39  ;;  %v1387_v44 = vld [vmem:[#allocation3 + $0x168] sm:$0x7f] }
 0x10e   :  { %v1486_v45 = vld [vmem:[#allocation3 + $0x1a0] sm:$0x7f]  ;;  %v1339_v46 = vld [vmem:[#allocation3 + $0x138] sm:$0x7f]  ;;  %1580 = vst.msk [vmem:[%s2160_s1 + $0x110] sm:$0x7f] %vm162_vm1, %v1531_v37  ;;  %v1533_v47 = vmax.f32 %v1434_v38, %v1484_v35  ;;  %v1436_v48 = vmax.f32 %v1338_v41, %v1387_v44 }
 0x10f   :  { %v1388_v49 = vld [vmem:[#allocation3 + $0x170] sm:$0x7f]  ;;  %v1487_v50 = vld [vmem:[#allocation3 + $0x1a8] sm:$0x7f]  ;;  %v1340_v51 = vld [vmem:[#allocation3 + $0x140] sm:$0x7f]  ;;  %v1534_v52 = vmax.f32 %v1435_v43, %v1485_v40 }
 0x110   :  { %1581 = vst [vmem:[%s2160_s1 + $0x118] sm:$0x7f] %v1532_v42  ;;  %v1437_v53 = vmax.f32 %v1339_v46, %v1388_v49  ;;  %v1389_v54 = vld [vmem:[#allocation3 + $0x178] sm:$0x7f]  ;;  %v1488_v55 = vld [vmem:[#allocation3 + $0x1b0] sm:$0x7f]  ;;  %v1535_v57 = vmax.f32 %v1436_v48, %v1486_v45 }
 0x111   :  { %v1341_v56 = vld [vmem:[#allocation3 + $0x148] sm:$0x7f]  ;;  %1582 = vst [vmem:[%s2160_s1 + $0x120] sm:$0x7f] %v1533_v47  ;;  %v1438_v58 = vmax.f32 %v1340_v51, %v1389_v54  ;;  %v1390_v59 = vld [vmem:[#allocation3 + $0x180] sm:$0x7f] }
 0x112   :  { %v1489_v60 = vld [vmem:[#allocation3 + $0x1b8] sm:$0x7f]  ;;  %v1342_v61 = vld [vmem:[#allocation3 + $0x150] sm:$0x7f]  ;;  %1583 = vst [vmem:[%s2160_s1 + $0x128] sm:$0x7f] %v1534_v52  ;;  %v1536_v62 = vmax.f32 %v1437_v53, %v1487_v50  ;;  %v1439_v63 = vmax.f32 %v1341_v56, %v1390_v59 }
 0x113   :  { %v1391_v0 = vld [vmem:[#allocation3 + $0x188] sm:$0x7f]  ;;  %v1490_v1 = vld [vmem:[#allocation3 + $0x1c0] sm:$0x7f]  ;;  %v1343_v2 = vld [vmem:[#allocation3 + $0x158] sm:$0x7f]  ;;  %v1537_v3 = vmax.f32 %v1438_v58, %v1488_v55 }
 0x114   :  { %1584 = vst [vmem:[%s2160_s1 + $0x130] sm:$0x7f] %v1535_v57  ;;  %v1440_v4 = vmax.f32 %v1342_v61, %v1391_v0  ;;  %v1392_v5 = vld [vmem:[#allocation3 + $0x190] sm:$0x7f]  ;;  %v1491_v6 = vld [vmem:[#allocation3 + $0x1c8] sm:$0x7f]  ;;  %v1538_v8 = vmax.f32 %v1439_v63, %v1489_v60 }
 0x115   :  { %v1344_v7 = vld [vmem:[#allocation3 + $0x160] sm:$0x7f]  ;;  %1585 = vst [vmem:[%s2160_s1 + $0x138] sm:$0x7f] %v1536_v62  ;;  %v1441_v9 = vmax.f32 %v1343_v2, %v1392_v5  ;;  %v1393_v10 = vld [vmem:[#allocation3 + $0x198] sm:$0x7f] }
 0x116   :  { %v1492_v11 = vld [vmem:[#allocation3 + $0x1d0] sm:$0x7f]  ;;  %v1345_v12 = vld [vmem:[#allocation3 + $0x168] sm:$0x7f]  ;;  %1586 = vst [vmem:[%s2160_s1 + $0x140] sm:$0x7f] %v1537_v3  ;;  %v1539_v13 = vmax.f32 %v1440_v4, %v1490_v1  ;;  %v1442_v14 = vmax.f32 %v1344_v7, %v1393_v10 }
 0x117   :  { %v1394_v15 = vld [vmem:[#allocation3 + $0x1a0] sm:$0x7f]  ;;  %v1493_v16 = vld [vmem:[#allocation3 + $0x1d8] sm:$0x7f]  ;;  %v1346_v17 = vld [vmem:[#allocation3 + $0x170] sm:$0x7f]  ;;  %v1540_v18 = vmax.f32 %v1441_v9, %v1491_v6 }
 0x118   :  { %1587 = vst.msk [vmem:[%s2160_s1 + $0x148] sm:$0x7f] %vm162_vm1, %v1538_v8  ;;  %v1443_v19 = vmax.f32 %v1345_v12, %v1394_v15  ;;  %v1395_v20 = vld [vmem:[#allocation3 + $0x1a8] sm:$0x7f]  ;;  %v1494_v21 = vld [vmem:[#allocation3 + $0x1e0] sm:$0x7f]  ;;  %v1541_v23 = vmax.f32 %v1442_v14, %v1492_v11 }
 0x119   :  { %v1347_v22 = vld [vmem:[#allocation3 + $0x178] sm:$0x7f]  ;;  %1588 = vst [vmem:[%s2160_s1 + $0x150] sm:$0x7f] %v1539_v13  ;;  %v1444_v24 = vmax.f32 %v1346_v17, %v1395_v20  ;;  %v1396_v25 = vld [vmem:[#allocation3 + $0x1b0] sm:$0x7f] }
 0x11a   :  { %v1495_v26 = vld [vmem:[#allocation3 + $0x1e8] sm:$0x7f]  ;;  %v1348_v27 = vld [vmem:[#allocation3 + $0x180] sm:$0x7f]  ;;  %1589 = vst [vmem:[%s2160_s1 + $0x158] sm:$0x7f] %v1540_v18  ;;  %v1542_v28 = vmax.f32 %v1443_v19, %v1493_v16  ;;  %v1445_v29 = vmax.f32 %v1347_v22, %v1396_v25 }
 0x11b   :  { %v1397_v30 = vld [vmem:[#allocation3 + $0x1b8] sm:$0x7f]  ;;  %v1496_v31 = vld [vmem:[#allocation3 + $0x1f0] sm:$0x7f]  ;;  %1590 = vst [vmem:[%s2160_s1 + $0x160] sm:$0x7f] %v1541_v23  ;;  %v1543_v32 = vmax.f32 %v1444_v24, %v1494_v21 }
 0x11c   :  { %v1446_v33 = vmax.f32 %v1348_v27, %v1397_v30  ;;  %1591 = vst [vmem:[%s2160_s1 + $0x168] sm:$0x7f] %v1542_v28  ;;  %v1544_v34 = vmax.f32 %v1445_v29, %v1495_v26 }
 0x11d   :  { %1592 = vst [vmem:[%s2160_s1 + $0x170] sm:$0x7f] %v1543_v32 }
 0x11e   :  { %v1545_v35 = vmax.f32 %v1446_v33, %v1496_v31  ;;  %1593 = vst [vmem:[%s2160_s1 + $0x178] sm:$0x7f] %v1544_v34 }
 0x120   :  { %1594 = vst.msk [vmem:[%s2160_s1 + $0x180] sm:$0x7f] %vm162_vm1, %v1545_v35 }

</bundles_post_ra>
